<compile_context>
chip_gen: v7x
topology: tpu7x:2x2x1
jax: 0.10.0
libtpu: 0.0.40
codegen_flags: <defaults>
</compile_context>

<pallas_src>
import math

import jax
import jax.numpy as jnp
from jax.experimental import pallas as pl
from jax.experimental.pallas import tpu as pltpu

# tanh-GELU rewritten via sigmoid:
#   0.5*h*(1 + tanh(c*(h + 0.044715*h^3))) == h * sigmoid(h*(2c + 2c*0.044715*h^2))
_GELU_K1 = 2.0 * math.sqrt(2.0 / math.pi)
_GELU_K2 = _GELU_K1 * 0.044715


def _round_up(n: int, m: int) -> int:
    return ((n + m - 1) // m) * m


def _gelu_f32(h):
    # ~5 VALU ops + 1 EUP transcendental, all in f32.
    return h * jax.nn.sigmoid(h * (_GELU_K1 + _GELU_K2 * (h * h)))


def _vmem_budget_bytes():
    """Conservative budget for keeping all weights VMEM-resident."""
    try:
        cap = pltpu.get_tpu_info().vmem_capacity_bytes
    except Exception:
        cap = 64 * 1024 * 1024  # assume the smallest (v7x) if the query fails
    return int(cap * 0.7)


def _choose_batch_tiling(B: int, max_tb: int = 256):
    """Batch block: multiple of 8, <= max_tb, balanced so padding never blows up
    the work (B=520 -> Bp=528, not 1024), and >= 2 blocks whenever possible so
    the 'parallel' grid axis can split across v7x's two TensorCores."""
    B8 = _round_up(max(B, 1), 8)
    n_blocks = max(2, -(-B8 // max_tb))
    TB = _round_up(-(-B8 // n_blocks), 8)
    TB = min(TB, B8)
    Bp = _round_up(B8, TB)
    return TB, Bp


def _make_fused_kernel(num_layers, add_residual_flags, compute_dtype):
    """Fused [Linear + GELU (+ residual)] x num_layers kernel body."""

    def kernel(*refs):
        x_ref, o_ref = refs[0], refs[-1]
        wb = refs[1:-1]  # w0, b0, w1, b1, ...
        x = x_ref[...].astype(jnp.float32)  # running activation stays f32
        for li in range(num_layers):
            w_ref, b_ref = wb[2 * li], wb[2 * li + 1]
            # bf16 (MXU-native) operands, f32 accumulation.
            h = jnp.dot(x.astype(compute_dtype), w_ref[...],
                        preferred_element_type=jnp.float32)
            h = h + b_ref[...]                      # (TB, Dout) + (1, Dout), f32
            g = _gelu_f32(h)
            x = (g + x) if add_residual_flags[li] else g   # residual in f32
        o_ref[...] = x.astype(o_ref.dtype)          # single cast at the end

    return kernel


def _make_layer_kernel(add_residual, compute_dtype):
    """Single-layer kernel for the weight-streaming fallback path."""

    def kernel(*refs):
        if add_residual:
            x_ref, w_ref, b_ref, r_ref, o_ref = refs
        else:
            x_ref, w_ref, b_ref, o_ref = refs
        h = jnp.dot(x_ref[...].astype(compute_dtype), w_ref[...],
                    preferred_element_type=jnp.float32)
        h = h + b_ref[...].astype(jnp.float32)
        g = _gelu_f32(h)
        if add_residual:
            g = g + r_ref[...].astype(jnp.float32)
        o_ref[...] = g.astype(o_ref.dtype)

    return kernel


def prepare_params(params, compute_dtype=jnp.bfloat16):
    """One-time parameter prep (hoisted out of the forward pass):
    pad every feature dim to a multiple of 128 (lane-dense) and cast weights to
    the MXU-native compute dtype.  Zero padding is exact through GELU/residual."""
    dims = [params[0][0].shape[0]] + [w.shape[1] for (w, _) in params]
    pdims = [_round_up(d, 128) for d in dims]
    padded = []
    for li, (w, b) in enumerate(params):
        din, dout = w.shape
        dpi, dpo = pdims[li], pdims[li + 1]
        wp = jnp.pad(w, ((0, dpi - din), (0, dpo - dout))).astype(compute_dtype)
        bp = jnp.pad(b.reshape(1, dout), ((0, 0), (0, dpo - dout))).astype(jnp.float32)
        padded.append((wp, bp))
    return {"padded": padded, "dims": dims, "pdims": pdims,
            "compute_dtype": compute_dtype}


def _fused_forward(xp, padded, pdims, add_flags, cdt, TB, fused_est, out_dtype):
    Bp = xp.shape[0]
    n_layers = len(padded)
    flat_wb = [a for pair in padded for a in pair]
    vmem_limit = int(min(128 * 1024 * 1024, max(32 * 1024 * 1024, 2 * fused_est)))

    def run(single_buffer_weights: bool):
        wb_kw = ({"pipeline_mode": pl.Buffered(1)} if single_buffer_weights else {})
        in_specs = [pl.BlockSpec((TB, pdims[0]), lambda i: (i, 0))]
        for li in range(n_layers):
            dpi, dpo = pdims[li], pdims[li + 1]
            # Weights/bias are grid-invariant -> VMEM-resident across all blocks.
            in_specs.append(pl.BlockSpec((dpi, dpo), lambda i: (0, 0), **wb_kw))
            in_specs.append(pl.BlockSpec((1, dpo), lambda i: (0, 0), **wb_kw))
        return pl.pallas_call(
            _make_fused_kernel(n_layers, add_flags, cdt),
            out_shape=jax.ShapeDtypeStruct((Bp, pdims[-1]), out_dtype),
            grid=(Bp // TB,),
            in_specs=in_specs,
            out_specs=pl.BlockSpec((TB, pdims[-1]), lambda i: (i, 0)),
            compiler_params=pltpu.CompilerParams(
                dimension_semantics=("parallel",),
                vmem_limit_bytes=vmem_limit),
        )(xp, *flat_wb)

    try:
        # Single-buffer the invariant weights/biases (halves their VMEM footprint).
        return run(True)
    except Exception:
        # Fallback if this jax build rejects pl.Buffered(1) on pallas_call specs.
        return run(False)


def _streamed_forward(xp, padded, pdims, add_flags, cdt, TB, out_dtype):
    """Weight-streaming fallback (e.g. very wide layers on v7x's 64 MiB VMEM):
    one pallas_call per layer, output features tiled over the grid so only a
    (Kp, TN) slab of each weight is VMEM-resident at a time."""
    Bp = xp.shape[0]
    n_layers = len(padded)
    w_item = jnp.dtype(cdt).itemsize
    act = xp
    for li, (wp, bp) in enumerate(padded):
        Kp, Np = pdims[li], pdims[li + 1]
        TN = min(512, Np)
        residual = add_flags[li]
        a_item = jnp.dtype(act.dtype).itemsize
        est = (2 * TB * Kp * a_item                       # activation blocks
               + 2 * (Kp * TN * w_item + TN * 4)          # weight + bias blocks
               + 2 * TB * TN * 4 * (2 if residual else 1)  # out (+ residual) blocks
               + 4 * TB * TN * 4)                          # f32 temporaries
        vmem_limit = int(min(128 * 1024 * 1024, max(32 * 1024 * 1024, 2 * est)))
        ly_dtype = out_dtype if li == n_layers - 1 else jnp.float32
        in_specs = [
            pl.BlockSpec((TB, Kp), lambda i, j: (i, 0)),
            pl.BlockSpec((Kp, TN), lambda i, j: (0, j)),
            pl.BlockSpec((1, TN), lambda i, j: (0, j)),
        ]
        args = [act, wp, bp]
        if residual:
            # din == dout here, so Kp == Np and block (i, j) of act is the residual.
            in_specs.append(pl.BlockSpec((TB, TN), lambda i, j: (i, j)))
            args.append(act)
        act = pl.pallas_call(
            _make_layer_kernel(residual, cdt),
            out_shape=jax.ShapeDtypeStruct((Bp, Np), ly_dtype),
            grid=(Bp // TB, pl.cdiv(Np, TN)),
            in_specs=in_specs,
            out_specs=pl.BlockSpec((TB, TN), lambda i, j: (i, j)),
            compiler_params=pltpu.CompilerParams(
                dimension_semantics=("parallel", "parallel"),
                vmem_limit_bytes=vmem_limit),
        )(*args)
    return act


def short_connections_forward(x, prepared, use_shortcut, vmem_budget_bytes=None):
    """Mirror of Shortconnections.forward using prepared (padded/cast) params."""
    dims, pdims = prepared["dims"], prepared["pdims"]
    padded, cdt = prepared["padded"], prepared["compute_dtype"]
    n_layers = len(padded)
    B, D0 = x.shape
    assert D0 == dims[0]
    # PyTorch: x.shape == layer_output.shape  <=>  din == dout here (static).
    add_flags = tuple(bool(use_shortcut and dims[li] == dims[li + 1])
                      for li in range(n_layers))

    TB, Bp = _choose_batch_tiling(B)
    xp = x
    if (Bp, pdims[0]) != (B, D0):
        xp = jnp.pad(x, ((0, Bp - B), (0, pdims[0] - D0)))

    w_item = jnp.dtype(cdt).itemsize
    weights_bytes = sum(pdims[li] * pdims[li + 1] * w_item + pdims[li + 1] * 4
                        for li in range(n_layers))
    act_item = jnp.dtype(xp.dtype).itemsize
    max_pd = max(pdims)
    fused_est = (weights_bytes
                 + 2 * TB * pdims[0] * act_item    # double-buffered input blocks
                 + 2 * TB * pdims[-1] * act_item   # double-buffered output blocks
                 + 6 * TB * max_pd * 4)            # f32 temporaries / headroom
    budget = _vmem_budget_bytes() if vmem_budget_bytes is None else vmem_budget_bytes

    if fused_est <= budget:
        out = _fused_forward(xp, padded, pdims, add_flags, cdt, TB, fused_est,
                             out_dtype=x.dtype)
    else:
        out = _streamed_forward(xp, padded, pdims, add_flags, cdt, TB,
                                out_dtype=x.dtype)

    # Strip batch / feature padding.
    # Note: for very narrow final layers this slice is extra HBM traffic; fuse
    # into the consumer if that ever matters.
    return out[:B, :dims[-1]]


def init_params(key, layer_size):
    """Deterministic PyTorch-like Linear init: U(-1/sqrt(fan_in), 1/sqrt(fan_in))."""
    params = []
    for i in range(len(layer_size) - 1):
        fan_in, fan_out = layer_size[i], layer_size[i + 1]
        key, kw, kb = jax.random.split(key, 3)
        bound = 1.0 / math.sqrt(fan_in)
        w = jax.random.uniform(kw, (fan_in, fan_out), dtype=jnp.float32,
                               minval=-bound, maxval=bound)
        b = jax.random.uniform(kb, (fan_out,), dtype=jnp.float32,
                               minval=-bound, maxval=bound)
        params.append((w, b))
    return params


def _reference_forward(x, params, use_shortcut):
    """Pure-JAX f32 reference (tanh-GELU, HIGHEST-precision matmul)."""
    c = math.sqrt(2.0 / math.pi)
    for (w, b) in params:
        h = jnp.dot(x, w, precision=jax.lax.Precision.HIGHEST) + b
        g = 0.5 * h * (1.0 + jnp.tanh(c * (h + 0.044715 * h ** 3)))
        x = x + g if (use_shortcut and x.shape == g.shape) else g
    return x


if __name__ == "__main__":
    # Small shapes: batch=16 gives >= 2 batch blocks (parallel grid), the final
    # 32->16 layer exercises the non-residual branch under use_shortcut=True.
    layer_size = [32, 32, 32, 32, 32, 16]
    use_shortcut = True
    batch = 16

    key = jax.random.PRNGKey(0)
    key, kx = jax.random.split(key)
    x = jax.random.normal(kx, (batch, layer_size[0]), dtype=jnp.float32)
    params = init_params(key, layer_size)
    ref = _reference_forward(x, params, use_shortcut)

    # 1) Fused kernel, bf16 MXU operands (default fast path).
    prep_bf16 = prepare_params(params, compute_dtype=jnp.bfloat16)
    out = jax.block_until_ready(
        short_connections_forward(x, prep_bf16, use_shortcut))
    assert out.shape == (batch, layer_size[-1])
    assert jnp.allclose(out, ref, atol=5e-2, rtol=5e-2), "bf16 fused mismatch"

    # 2) Fused kernel, f32 operands: tight-tolerance correctness check.
    prep_f32 = prepare_params(params, compute_dtype=jnp.float32)
    out_f32 = jax.block_until_ready(
        short_connections_forward(x, prep_f32, use_shortcut))
    assert jnp.allclose(out_f32, ref, atol=1e-4, rtol=1e-4), "f32 fused mismatch"

    # 3) Weight-streaming fallback path, forced via a zero VMEM budget.
    out_stream = jax.block_until_ready(
        short_connections_forward(x, prep_bf16, use_shortcut, vmem_budget_bytes=0))
    assert jnp.allclose(out_stream, ref, atol=5e-2, rtol=5e-2), "streamed mismatch"

    # 4) No-shortcut branch.
    ref_ns = _reference_forward(x, params, False)
    out_ns = jax.block_until_ready(short_connections_forward(x, prep_f32, False))
    assert jnp.allclose(out_ns, ref_ns, atol=1e-4, rtol=1e-4), "no-shortcut mismatch"

    print("KERNEL_OK")
</pallas_src>

<mosaic_0001>
module attributes {stable_mosaic.version = 11 : i64} {
  func.func @kernel(%arg0: i32, %arg1: memref<8x128xf32, #tpu.memory_space<vmem>>, %arg2: memref<128x128xbf16, #tpu.memory_space<vmem>>, %arg3: memref<1x128xf32, #tpu.memory_space<vmem>>, %arg4: memref<128x128xbf16, #tpu.memory_space<vmem>>, %arg5: memref<1x128xf32, #tpu.memory_space<vmem>>, %arg6: memref<128x128xbf16, #tpu.memory_space<vmem>>, %arg7: memref<1x128xf32, #tpu.memory_space<vmem>>, %arg8: memref<128x128xbf16, #tpu.memory_space<vmem>>, %arg9: memref<1x128xf32, #tpu.memory_space<vmem>>, %arg10: memref<128x128xbf16, #tpu.memory_space<vmem>>, %arg11: memref<1x128xf32, #tpu.memory_space<vmem>>, %arg12: memref<8x128xf32, #tpu.memory_space<vmem>>) attributes {dimension_semantics = [#tpu.dimension_semantics<parallel>], iteration_bounds = array<i64: 2>, scalar_prefetch = 0 : i64, scratch_operands = 0 : i64, tpu.core_type = #tpu.core_type<tc>, window_params = [{transform_indices = @transform_0, window_bounds = array<i64: 8, 128>}, {pipeline_mode = #tpu.pipeline_mode<synchronous>, transform_indices = @transform_1, window_bounds = array<i64: 128, 128>}, {pipeline_mode = #tpu.pipeline_mode<synchronous>, transform_indices = @transform_2, window_bounds = array<i64: 1, 128>}, {pipeline_mode = #tpu.pipeline_mode<synchronous>, transform_indices = @transform_3, window_bounds = array<i64: 128, 128>}, {pipeline_mode = #tpu.pipeline_mode<synchronous>, transform_indices = @transform_4, window_bounds = array<i64: 1, 128>}, {pipeline_mode = #tpu.pipeline_mode<synchronous>, transform_indices = @transform_5, window_bounds = array<i64: 128, 128>}, {pipeline_mode = #tpu.pipeline_mode<synchronous>, transform_indices = @transform_6, window_bounds = array<i64: 1, 128>}, {pipeline_mode = #tpu.pipeline_mode<synchronous>, transform_indices = @transform_7, window_bounds = array<i64: 128, 128>}, {pipeline_mode = #tpu.pipeline_mode<synchronous>, transform_indices = @transform_8, window_bounds = array<i64: 1, 128>}, {pipeline_mode = #tpu.pipeline_mode<synchronous>, transform_indices = @transform_9, window_bounds = array<i64: 128, 128>}, {pipeline_mode = #tpu.pipeline_mode<synchronous>, transform_indices = @transform_10, window_bounds = array<i64: 1, 128>}, {transform_indices = @transform_11, window_bounds = array<i64: 8, 128>}]} {
    %c0 = arith.constant 0 : index
    %c0_0 = arith.constant 0 : index
    %0 = vector.load %arg1[%c0, %c0_0] : memref<8x128xf32, #tpu.memory_space<vmem>>, vector<8x128xf32>
    %1 = arith.truncf %0 : vector<8x128xf32> to vector<8x128xbf16>
    %c0_1 = arith.constant 0 : index
    %c0_2 = arith.constant 0 : index
    %2 = vector.load %arg2[%c0_1, %c0_2] : memref<128x128xbf16, #tpu.memory_space<vmem>>, vector<128x128xbf16>
    %cst = arith.constant dense<0.000000e+00> : vector<8x128xf32>
    %3 = tpu.matmul %1, %2, %cst {dimension_numbers = #tpu.dot_dimension_numbers<[1], [0], [0], [1], [0, 0, 1, 1], [], []>} : vector<8x128xbf16>, vector<128x128xbf16>, vector<8x128xf32> -> vector<8x128xf32>
    %c0_3 = arith.constant 0 : index
    %c0_4 = arith.constant 0 : index
    %4 = vector.load %arg3[%c0_3, %c0_4] : memref<1x128xf32, #tpu.memory_space<vmem>>, vector<1x128xf32>
    %5 = vector.broadcast %4 : vector<1x128xf32> to vector<8x128xf32>
    %6 = arith.addf %3, %5 : vector<8x128xf32>
    %7 = arith.mulf %6, %6 : vector<8x128xf32>
    %cst_5 = arith.constant 0.0713548139 : f32
    %8 = vector.broadcast %cst_5 : f32 to vector<8x128xf32>
    %9 = arith.mulf %8, %7 : vector<8x128xf32>
    %cst_6 = arith.constant 1.59576917 : f32
    %10 = vector.broadcast %cst_6 : f32 to vector<8x128xf32>
    %11 = arith.addf %10, %9 : vector<8x128xf32>
    %12 = arith.mulf %6, %11 : vector<8x128xf32>
    %13 = arith.negf %12 : vector<8x128xf32>
    %14 = math.exp %13 : vector<8x128xf32>
    %cst_7 = arith.constant 1.000000e+00 : f32
    %15 = vector.broadcast %cst_7 : f32 to vector<8x128xf32>
    %16 = arith.addf %15, %14 : vector<8x128xf32>
    %17 = arith.divf %15, %16 : vector<8x128xf32>
    %18 = arith.mulf %6, %17 : vector<8x128xf32>
    %19 = arith.addf %18, %0 : vector<8x128xf32>
    %20 = arith.truncf %19 : vector<8x128xf32> to vector<8x128xbf16>
    %c0_8 = arith.constant 0 : index
    %c0_9 = arith.constant 0 : index
    %21 = vector.load %arg4[%c0_8, %c0_9] : memref<128x128xbf16, #tpu.memory_space<vmem>>, vector<128x128xbf16>
    %cst_10 = arith.constant dense<0.000000e+00> : vector<8x128xf32>
    %22 = tpu.matmul %20, %21, %cst_10 {dimension_numbers = #tpu.dot_dimension_numbers<[1], [0], [0], [1], [0, 0, 1, 1], [], []>} : vector<8x128xbf16>, vector<128x128xbf16>, vector<8x128xf32> -> vector<8x128xf32>
    %c0_11 = arith.constant 0 : index
    %c0_12 = arith.constant 0 : index
    %23 = vector.load %arg5[%c0_11, %c0_12] : memref<1x128xf32, #tpu.memory_space<vmem>>, vector<1x128xf32>
    %24 = vector.broadcast %23 : vector<1x128xf32> to vector<8x128xf32>
    %25 = arith.addf %22, %24 : vector<8x128xf32>
    %26 = arith.mulf %25, %25 : vector<8x128xf32>
    %cst_13 = arith.constant 0.0713548139 : f32
    %27 = vector.broadcast %cst_13 : f32 to vector<8x128xf32>
    %28 = arith.mulf %27, %26 : vector<8x128xf32>
    %cst_14 = arith.constant 1.59576917 : f32
    %29 = vector.broadcast %cst_14 : f32 to vector<8x128xf32>
    %30 = arith.addf %29, %28 : vector<8x128xf32>
    %31 = arith.mulf %25, %30 : vector<8x128xf32>
    %32 = arith.negf %31 : vector<8x128xf32>
    %33 = math.exp %32 : vector<8x128xf32>
    %cst_15 = arith.constant 1.000000e+00 : f32
    %34 = vector.broadcast %cst_15 : f32 to vector<8x128xf32>
    %35 = arith.addf %34, %33 : vector<8x128xf32>
    %36 = arith.divf %34, %35 : vector<8x128xf32>
    %37 = arith.mulf %25, %36 : vector<8x128xf32>
    %38 = arith.addf %37, %19 : vector<8x128xf32>
    %39 = arith.truncf %38 : vector<8x128xf32> to vector<8x128xbf16>
    %c0_16 = arith.constant 0 : index
    %c0_17 = arith.constant 0 : index
    %40 = vector.load %arg6[%c0_16, %c0_17] : memref<128x128xbf16, #tpu.memory_space<vmem>>, vector<128x128xbf16>
    %cst_18 = arith.constant dense<0.000000e+00> : vector<8x128xf32>
    %41 = tpu.matmul %39, %40, %cst_18 {dimension_numbers = #tpu.dot_dimension_numbers<[1], [0], [0], [1], [0, 0, 1, 1], [], []>} : vector<8x128xbf16>, vector<128x128xbf16>, vector<8x128xf32> -> vector<8x128xf32>
    %c0_19 = arith.constant 0 : index
    %c0_20 = arith.constant 0 : index
    %42 = vector.load %arg7[%c0_19, %c0_20] : memref<1x128xf32, #tpu.memory_space<vmem>>, vector<1x128xf32>
    %43 = vector.broadcast %42 : vector<1x128xf32> to vector<8x128xf32>
    %44 = arith.addf %41, %43 : vector<8x128xf32>
    %45 = arith.mulf %44, %44 : vector<8x128xf32>
    %cst_21 = arith.constant 0.0713548139 : f32
    %46 = vector.broadcast %cst_21 : f32 to vector<8x128xf32>
    %47 = arith.mulf %46, %45 : vector<8x128xf32>
    %cst_22 = arith.constant 1.59576917 : f32
    %48 = vector.broadcast %cst_22 : f32 to vector<8x128xf32>
    %49 = arith.addf %48, %47 : vector<8x128xf32>
    %50 = arith.mulf %44, %49 : vector<8x128xf32>
    %51 = arith.negf %50 : vector<8x128xf32>
    %52 = math.exp %51 : vector<8x128xf32>
    %cst_23 = arith.constant 1.000000e+00 : f32
    %53 = vector.broadcast %cst_23 : f32 to vector<8x128xf32>
    %54 = arith.addf %53, %52 : vector<8x128xf32>
    %55 = arith.divf %53, %54 : vector<8x128xf32>
    %56 = arith.mulf %44, %55 : vector<8x128xf32>
    %57 = arith.addf %56, %38 : vector<8x128xf32>
    %58 = arith.truncf %57 : vector<8x128xf32> to vector<8x128xbf16>
    %c0_24 = arith.constant 0 : index
    %c0_25 = arith.constant 0 : index
    %59 = vector.load %arg8[%c0_24, %c0_25] : memref<128x128xbf16, #tpu.memory_space<vmem>>, vector<128x128xbf16>
    %cst_26 = arith.constant dense<0.000000e+00> : vector<8x128xf32>
    %60 = tpu.matmul %58, %59, %cst_26 {dimension_numbers = #tpu.dot_dimension_numbers<[1], [0], [0], [1], [0, 0, 1, 1], [], []>} : vector<8x128xbf16>, vector<128x128xbf16>, vector<8x128xf32> -> vector<8x128xf32>
    %c0_27 = arith.constant 0 : index
    %c0_28 = arith.constant 0 : index
    %61 = vector.load %arg9[%c0_27, %c0_28] : memref<1x128xf32, #tpu.memory_space<vmem>>, vector<1x128xf32>
    %62 = vector.broadcast %61 : vector<1x128xf32> to vector<8x128xf32>
    %63 = arith.addf %60, %62 : vector<8x128xf32>
    %64 = arith.mulf %63, %63 : vector<8x128xf32>
    %cst_29 = arith.constant 0.0713548139 : f32
    %65 = vector.broadcast %cst_29 : f32 to vector<8x128xf32>
    %66 = arith.mulf %65, %64 : vector<8x128xf32>
    %cst_30 = arith.constant 1.59576917 : f32
    %67 = vector.broadcast %cst_30 : f32 to vector<8x128xf32>
    %68 = arith.addf %67, %66 : vector<8x128xf32>
    %69 = arith.mulf %63, %68 : vector<8x128xf32>
    %70 = arith.negf %69 : vector<8x128xf32>
    %71 = math.exp %70 : vector<8x128xf32>
    %cst_31 = arith.constant 1.000000e+00 : f32
    %72 = vector.broadcast %cst_31 : f32 to vector<8x128xf32>
    %73 = arith.addf %72, %71 : vector<8x128xf32>
    %74 = arith.divf %72, %73 : vector<8x128xf32>
    %75 = arith.mulf %63, %74 : vector<8x128xf32>
    %76 = arith.addf %75, %57 : vector<8x128xf32>
    %77 = arith.truncf %76 : vector<8x128xf32> to vector<8x128xbf16>
    %c0_32 = arith.constant 0 : index
    %c0_33 = arith.constant 0 : index
    %78 = vector.load %arg10[%c0_32, %c0_33] : memref<128x128xbf16, #tpu.memory_space<vmem>>, vector<128x128xbf16>
    %cst_34 = arith.constant dense<0.000000e+00> : vector<8x128xf32>
    %79 = tpu.matmul %77, %78, %cst_34 {dimension_numbers = #tpu.dot_dimension_numbers<[1], [0], [0], [1], [0, 0, 1, 1], [], []>} : vector<8x128xbf16>, vector<128x128xbf16>, vector<8x128xf32> -> vector<8x128xf32>
    %c0_35 = arith.constant 0 : index
    %c0_36 = arith.constant 0 : index
    %80 = vector.load %arg11[%c0_35, %c0_36] : memref<1x128xf32, #tpu.memory_space<vmem>>, vector<1x128xf32>
    %81 = vector.broadcast %80 : vector<1x128xf32> to vector<8x128xf32>
    %82 = arith.addf %79, %81 : vector<8x128xf32>
    %83 = arith.mulf %82, %82 : vector<8x128xf32>
    %cst_37 = arith.constant 0.0713548139 : f32
    %84 = vector.broadcast %cst_37 : f32 to vector<8x128xf32>
    %85 = arith.mulf %84, %83 : vector<8x128xf32>
    %cst_38 = arith.constant 1.59576917 : f32
    %86 = vector.broadcast %cst_38 : f32 to vector<8x128xf32>
    %87 = arith.addf %86, %85 : vector<8x128xf32>
    %88 = arith.mulf %82, %87 : vector<8x128xf32>
    %89 = arith.negf %88 : vector<8x128xf32>
    %90 = math.exp %89 : vector<8x128xf32>
    %cst_39 = arith.constant 1.000000e+00 : f32
    %91 = vector.broadcast %cst_39 : f32 to vector<8x128xf32>
    %92 = arith.addf %91, %90 : vector<8x128xf32>
    %93 = arith.divf %91, %92 : vector<8x128xf32>
    %94 = arith.mulf %82, %93 : vector<8x128xf32>
    %c0_40 = arith.constant 0 : index
    %c0_41 = arith.constant 0 : index
    %95 = vector.load %arg12[%c0_40, %c0_41] : memref<8x128xf32, #tpu.memory_space<vmem>>, vector<8x128xf32>
    tpu.vector_store %arg12[%c0_40, %c0_41], %94 {strides = array<i32>} : memref<8x128xf32, #tpu.memory_space<vmem>>, vector<8x128xf32>,
    return
  }
  func.func @transform_0(%arg0: i32) -> (i32, i32) {
    %c0_i32 = arith.constant 0 : i32
    %c0_i32_0 = arith.constant 0 : i32
    return %arg0, %c0_i32 : i32, i32
  }
  func.func @transform_1(%arg0: i32) -> (i32, i32) {
    %c0_i32 = arith.constant 0 : i32
    %c0_i32_0 = arith.constant 0 : i32
    %c0_i32_1 = arith.constant 0 : i32
    return %c0_i32, %c0_i32_0 : i32, i32
  }
  func.func @transform_2(%arg0: i32) -> (i32, i32) {
    %c0_i32 = arith.constant 0 : i32
    %c0_i32_0 = arith.constant 0 : i32
    %c0_i32_1 = arith.constant 0 : i32
    return %c0_i32, %c0_i32_0 : i32, i32
  }
  func.func @transform_3(%arg0: i32) -> (i32, i32) {
    %c0_i32 = arith.constant 0 : i32
    %c0_i32_0 = arith.constant 0 : i32
    %c0_i32_1 = arith.constant 0 : i32
    return %c0_i32, %c0_i32_0 : i32, i32
  }
  func.func @transform_4(%arg0: i32) -> (i32, i32) {
    %c0_i32 = arith.constant 0 : i32
    %c0_i32_0 = arith.constant 0 : i32
    %c0_i32_1 = arith.constant 0 : i32
    return %c0_i32, %c0_i32_0 : i32, i32
  }
  func.func @transform_5(%arg0: i32) -> (i32, i32) {
    %c0_i32 = arith.constant 0 : i32
    %c0_i32_0 = arith.constant 0 : i32
    %c0_i32_1 = arith.constant 0 : i32
    return %c0_i32, %c0_i32_0 : i32, i32
  }
  func.func @transform_6(%arg0: i32) -> (i32, i32) {
    %c0_i32 = arith.constant 0 : i32
    %c0_i32_0 = arith.constant 0 : i32
    %c0_i32_1 = arith.constant 0 : i32
    return %c0_i32, %c0_i32_0 : i32, i32
  }
  func.func @transform_7(%arg0: i32) -> (i32, i32) {
    %c0_i32 = arith.constant 0 : i32
    %c0_i32_0 = arith.constant 0 : i32
    %c0_i32_1 = arith.constant 0 : i32
    return %c0_i32, %c0_i32_0 : i32, i32
  }
  func.func @transform_8(%arg0: i32) -> (i32, i32) {
    %c0_i32 = arith.constant 0 : i32
    %c0_i32_0 = arith.constant 0 : i32
    %c0_i32_1 = arith.constant 0 : i32
    return %c0_i32, %c0_i32_0 : i32, i32
  }
  func.func @transform_9(%arg0: i32) -> (i32, i32) {
    %c0_i32 = arith.constant 0 : i32
    %c0_i32_0 = arith.constant 0 : i32
    %c0_i32_1 = arith.constant 0 : i32
    return %c0_i32, %c0_i32_0 : i32, i32
  }
  func.func @transform_10(%arg0: i32) -> (i32, i32) {
    %c0_i32 = arith.constant 0 : i32
    %c0_i32_0 = arith.constant 0 : i32
    %c0_i32_1 = arith.constant 0 : i32
    return %c0_i32, %c0_i32_0 : i32, i32
  }
  func.func @transform_11(%arg0: i32) -> (i32, i32) {
    %c0_i32 = arith.constant 0 : i32
    %c0_i32_0 = arith.constant 0 : i32
    return %arg0, %c0_i32 : i32, i32
  }
}

module attributes {stable_mosaic.version = 11 : i64} {
  func.func @kernel(%arg0: i32, %arg1: memref<8x128xf32, #tpu.memory_space<vmem>>, %arg2: memref<128x128xbf16, #tpu.memory_space<vmem>>, %arg3: memref<1x128xf32, #tpu.memory_space<vmem>>, %arg4: memref<128x128xbf16, #tpu.memory_space<vmem>>, %arg5: memref<1x128xf32, #tpu.memory_space<vmem>>, %arg6: memref<128x128xbf16, #tpu.memory_space<vmem>>, %arg7: memref<1x128xf32, #tpu.memory_space<vmem>>, %arg8: memref<128x128xbf16, #tpu.memory_space<vmem>>, %arg9: memref<1x128xf32, #tpu.memory_space<vmem>>, %arg10: memref<128x128xbf16, #tpu.memory_space<vmem>>, %arg11: memref<1x128xf32, #tpu.memory_space<vmem>>, %arg12: memref<8x128xf32, #tpu.memory_space<vmem>>) attributes {dimension_semantics = [#tpu.dimension_semantics<parallel>], iteration_bounds = array<i64: 2>, scalar_prefetch = 0 : i64, scratch_operands = 0 : i64, tpu.core_type = #tpu.core_type<tc>, window_params = [{transform_indices = @transform_0, window_bounds = array<i64: 8, 128>}, {pipeline_mode = #tpu.pipeline_mode<synchronous>, transform_indices = @transform_1, window_bounds = array<i64: 128, 128>}, {pipeline_mode = #tpu.pipeline_mode<synchronous>, transform_indices = @transform_2, window_bounds = array<i64: 1, 128>}, {pipeline_mode = #tpu.pipeline_mode<synchronous>, transform_indices = @transform_3, window_bounds = array<i64: 128, 128>}, {pipeline_mode = #tpu.pipeline_mode<synchronous>, transform_indices = @transform_4, window_bounds = array<i64: 1, 128>}, {pipeline_mode = #tpu.pipeline_mode<synchronous>, transform_indices = @transform_5, window_bounds = array<i64: 128, 128>}, {pipeline_mode = #tpu.pipeline_mode<synchronous>, transform_indices = @transform_6, window_bounds = array<i64: 1, 128>}, {pipeline_mode = #tpu.pipeline_mode<synchronous>, transform_indices = @transform_7, window_bounds = array<i64: 128, 128>}, {pipeline_mode = #tpu.pipeline_mode<synchronous>, transform_indices = @transform_8, window_bounds = array<i64: 1, 128>}, {pipeline_mode = #tpu.pipeline_mode<synchronous>, transform_indices = @transform_9, window_bounds = array<i64: 128, 128>}, {pipeline_mode = #tpu.pipeline_mode<synchronous>, transform_indices = @transform_10, window_bounds = array<i64: 1, 128>}, {transform_indices = @transform_11, window_bounds = array<i64: 8, 128>}]} {
    %c0 = arith.constant 0 : index
    %c0_0 = arith.constant 0 : index
    %0 = vector.load %arg1[%c0, %c0_0] : memref<8x128xf32, #tpu.memory_space<vmem>>, vector<8x128xf32>
    %1 = arith.truncf %0 : vector<8x128xf32> to vector<8x128xbf16>
    %c0_1 = arith.constant 0 : index
    %c0_2 = arith.constant 0 : index
    %2 = vector.load %arg2[%c0_1, %c0_2] : memref<128x128xbf16, #tpu.memory_space<vmem>>, vector<128x128xbf16>
    %cst = arith.constant dense<0.000000e+00> : vector<8x128xf32>
    %3 = tpu.matmul %1, %2, %cst {dimension_numbers = #tpu.dot_dimension_numbers<[1], [0], [0], [1], [0, 0, 1, 1], [], []>} : vector<8x128xbf16>, vector<128x128xbf16>, vector<8x128xf32> -> vector<8x128xf32>
    %c0_3 = arith.constant 0 : index
    %c0_4 = arith.constant 0 : index
    %4 = vector.load %arg3[%c0_3, %c0_4] : memref<1x128xf32, #tpu.memory_space<vmem>>, vector<1x128xf32>
    %5 = vector.broadcast %4 : vector<1x128xf32> to vector<8x128xf32>
    %6 = arith.addf %3, %5 : vector<8x128xf32>
    %7 = arith.mulf %6, %6 : vector<8x128xf32>
    %cst_5 = arith.constant 0.0713548139 : f32
    %8 = vector.broadcast %cst_5 : f32 to vector<8x128xf32>
    %9 = arith.mulf %8, %7 : vector<8x128xf32>
    %cst_6 = arith.constant 1.59576917 : f32
    %10 = vector.broadcast %cst_6 : f32 to vector<8x128xf32>
    %11 = arith.addf %10, %9 : vector<8x128xf32>
    %12 = arith.mulf %6, %11 : vector<8x128xf32>
    %13 = arith.negf %12 : vector<8x128xf32>
    %14 = math.exp %13 : vector<8x128xf32>
    %cst_7 = arith.constant 1.000000e+00 : f32
    %15 = vector.broadcast %cst_7 : f32 to vector<8x128xf32>
    %16 = arith.addf %15, %14 : vector<8x128xf32>
    %17 = arith.divf %15, %16 : vector<8x128xf32>
    %18 = arith.mulf %6, %17 : vector<8x128xf32>
    %19 = arith.addf %18, %0 : vector<8x128xf32>
    %20 = arith.truncf %19 : vector<8x128xf32> to vector<8x128xbf16>
    %c0_8 = arith.constant 0 : index
    %c0_9 = arith.constant 0 : index
    %21 = vector.load %arg4[%c0_8, %c0_9] : memref<128x128xbf16, #tpu.memory_space<vmem>>, vector<128x128xbf16>
    %cst_10 = arith.constant dense<0.000000e+00> : vector<8x128xf32>
    %22 = tpu.matmul %20, %21, %cst_10 {dimension_numbers = #tpu.dot_dimension_numbers<[1], [0], [0], [1], [0, 0, 1, 1], [], []>} : vector<8x128xbf16>, vector<128x128xbf16>, vector<8x128xf32> -> vector<8x128xf32>
    %c0_11 = arith.constant 0 : index
    %c0_12 = arith.constant 0 : index
    %23 = vector.load %arg5[%c0_11, %c0_12] : memref<1x128xf32, #tpu.memory_space<vmem>>, vector<1x128xf32>
    %24 = vector.broadcast %23 : vector<1x128xf32> to vector<8x128xf32>
    %25 = arith.addf %22, %24 : vector<8x128xf32>
    %26 = arith.mulf %25, %25 : vector<8x128xf32>
    %cst_13 = arith.constant 0.0713548139 : f32
    %27 = vector.broadcast %cst_13 : f32 to vector<8x128xf32>
    %28 = arith.mulf %27, %26 : vector<8x128xf32>
    %cst_14 = arith.constant 1.59576917 : f32
    %29 = vector.broadcast %cst_14 : f32 to vector<8x128xf32>
    %30 = arith.addf %29, %28 : vector<8x128xf32>
    %31 = arith.mulf %25, %30 : vector<8x128xf32>
    %32 = arith.negf %31 : vector<8x128xf32>
    %33 = math.exp %32 : vector<8x128xf32>
    %cst_15 = arith.constant 1.000000e+00 : f32
    %34 = vector.broadcast %cst_15 : f32 to vector<8x128xf32>
    %35 = arith.addf %34, %33 : vector<8x128xf32>
    %36 = arith.divf %34, %35 : vector<8x128xf32>
    %37 = arith.mulf %25, %36 : vector<8x128xf32>
    %38 = arith.addf %37, %19 : vector<8x128xf32>
    %39 = arith.truncf %38 : vector<8x128xf32> to vector<8x128xbf16>
    %c0_16 = arith.constant 0 : index
    %c0_17 = arith.constant 0 : index
    %40 = vector.load %arg6[%c0_16, %c0_17] : memref<128x128xbf16, #tpu.memory_space<vmem>>, vector<128x128xbf16>
    %cst_18 = arith.constant dense<0.000000e+00> : vector<8x128xf32>
    %41 = tpu.matmul %39, %40, %cst_18 {dimension_numbers = #tpu.dot_dimension_numbers<[1], [0], [0], [1], [0, 0, 1, 1], [], []>} : vector<8x128xbf16>, vector<128x128xbf16>, vector<8x128xf32> -> vector<8x128xf32>
    %c0_19 = arith.constant 0 : index
    %c0_20 = arith.constant 0 : index
    %42 = vector.load %arg7[%c0_19, %c0_20] : memref<1x128xf32, #tpu.memory_space<vmem>>, vector<1x128xf32>
    %43 = vector.broadcast %42 : vector<1x128xf32> to vector<8x128xf32>
    %44 = arith.addf %41, %43 : vector<8x128xf32>
    %45 = arith.mulf %44, %44 : vector<8x128xf32>
    %cst_21 = arith.constant 0.0713548139 : f32
    %46 = vector.broadcast %cst_21 : f32 to vector<8x128xf32>
    %47 = arith.mulf %46, %45 : vector<8x128xf32>
    %cst_22 = arith.constant 1.59576917 : f32
    %48 = vector.broadcast %cst_22 : f32 to vector<8x128xf32>
    %49 = arith.addf %48, %47 : vector<8x128xf32>
    %50 = arith.mulf %44, %49 : vector<8x128xf32>
    %51 = arith.negf %50 : vector<8x128xf32>
    %52 = math.exp %51 : vector<8x128xf32>
    %cst_23 = arith.constant 1.000000e+00 : f32
    %53 = vector.broadcast %cst_23 : f32 to vector<8x128xf32>
    %54 = arith.addf %53, %52 : vector<8x128xf32>
    %55 = arith.divf %53, %54 : vector<8x128xf32>
    %56 = arith.mulf %44, %55 : vector<8x128xf32>
    %57 = arith.addf %56, %38 : vector<8x128xf32>
    %58 = arith.truncf %57 : vector<8x128xf32> to vector<8x128xbf16>
    %c0_24 = arith.constant 0 : index
    %c0_25 = arith.constant 0 : index
    %59 = vector.load %arg8[%c0_24, %c0_25] : memref<128x128xbf16, #tpu.memory_space<vmem>>, vector<128x128xbf16>
    %cst_26 = arith.constant dense<0.000000e+00> : vector<8x128xf32>
    %60 = tpu.matmul %58, %59, %cst_26 {dimension_numbers = #tpu.dot_dimension_numbers<[1], [0], [0], [1], [0, 0, 1, 1], [], []>} : vector<8x128xbf16>, vector<128x128xbf16>, vector<8x128xf32> -> vector<8x128xf32>
    %c0_27 = arith.constant 0 : index
    %c0_28 = arith.constant 0 : index
    %61 = vector.load %arg9[%c0_27, %c0_28] : memref<1x128xf32, #tpu.memory_space<vmem>>, vector<1x128xf32>
    %62 = vector.broadcast %61 : vector<1x128xf32> to vector<8x128xf32>
    %63 = arith.addf %60, %62 : vector<8x128xf32>
    %64 = arith.mulf %63, %63 : vector<8x128xf32>
    %cst_29 = arith.constant 0.0713548139 : f32
    %65 = vector.broadcast %cst_29 : f32 to vector<8x128xf32>
    %66 = arith.mulf %65, %64 : vector<8x128xf32>
    %cst_30 = arith.constant 1.59576917 : f32
    %67 = vector.broadcast %cst_30 : f32 to vector<8x128xf32>
    %68 = arith.addf %67, %66 : vector<8x128xf32>
    %69 = arith.mulf %63, %68 : vector<8x128xf32>
    %70 = arith.negf %69 : vector<8x128xf32>
    %71 = math.exp %70 : vector<8x128xf32>
    %cst_31 = arith.constant 1.000000e+00 : f32
    %72 = vector.broadcast %cst_31 : f32 to vector<8x128xf32>
    %73 = arith.addf %72, %71 : vector<8x128xf32>
    %74 = arith.divf %72, %73 : vector<8x128xf32>
    %75 = arith.mulf %63, %74 : vector<8x128xf32>
    %76 = arith.addf %75, %57 : vector<8x128xf32>
    %77 = arith.truncf %76 : vector<8x128xf32> to vector<8x128xbf16>
    %c0_32 = arith.constant 0 : index
    %c0_33 = arith.constant 0 : index
    %78 = vector.load %arg10[%c0_32, %c0_33] : memref<128x128xbf16, #tpu.memory_space<vmem>>, vector<128x128xbf16>
    %cst_34 = arith.constant dense<0.000000e+00> : vector<8x128xf32>
    %79 = tpu.matmul %77, %78, %cst_34 {dimension_numbers = #tpu.dot_dimension_numbers<[1], [0], [0], [1], [0, 0, 1, 1], [], []>} : vector<8x128xbf16>, vector<128x128xbf16>, vector<8x128xf32> -> vector<8x128xf32>
    %c0_35 = arith.constant 0 : index
    %c0_36 = arith.constant 0 : index
    %80 = vector.load %arg11[%c0_35, %c0_36] : memref<1x128xf32, #tpu.memory_space<vmem>>, vector<1x128xf32>
    %81 = vector.broadcast %80 : vector<1x128xf32> to vector<8x128xf32>
    %82 = arith.addf %79, %81 : vector<8x128xf32>
    %83 = arith.mulf %82, %82 : vector<8x128xf32>
    %cst_37 = arith.constant 0.0713548139 : f32
    %84 = vector.broadcast %cst_37 : f32 to vector<8x128xf32>
    %85 = arith.mulf %84, %83 : vector<8x128xf32>
    %cst_38 = arith.constant 1.59576917 : f32
    %86 = vector.broadcast %cst_38 : f32 to vector<8x128xf32>
    %87 = arith.addf %86, %85 : vector<8x128xf32>
    %88 = arith.mulf %82, %87 : vector<8x128xf32>
    %89 = arith.negf %88 : vector<8x128xf32>
    %90 = math.exp %89 : vector<8x128xf32>
    %cst_39 = arith.constant 1.000000e+00 : f32
    %91 = vector.broadcast %cst_39 : f32 to vector<8x128xf32>
    %92 = arith.addf %91, %90 : vector<8x128xf32>
    %93 = arith.divf %91, %92 : vector<8x128xf32>
    %94 = arith.mulf %82, %93 : vector<8x128xf32>
    %c0_40 = arith.constant 0 : index
    %c0_41 = arith.constant 0 : index
    %95 = vector.load %arg12[%c0_40, %c0_41] : memref<8x128xf32, #tpu.memory_space<vmem>>, vector<8x128xf32>
    tpu.vector_store %arg12[%c0_40, %c0_41], %94 {strides = array<i32>} : memref<8x128xf32, #tpu.memory_space<vmem>>, vector<8x128xf32>,
    return
  }
  func.func @transform_0(%arg0: i32) -> (i32, i32) {
    %c0_i32 = arith.constant 0 : i32
    %c0_i32_0 = arith.constant 0 : i32
    return %arg0, %c0_i32 : i32, i32
  }
  func.func @transform_1(%arg0: i32) -> (i32, i32) {
    %c0_i32 = arith.constant 0 : i32
    %c0_i32_0 = arith.constant 0 : i32
    %c0_i32_1 = arith.constant 0 : i32
    return %c0_i32, %c0_i32_0 : i32, i32
  }
  func.func @transform_2(%arg0: i32) -> (i32, i32) {
    %c0_i32 = arith.constant 0 : i32
    %c0_i32_0 = arith.constant 0 : i32
    %c0_i32_1 = arith.constant 0 : i32
    return %c0_i32, %c0_i32_0 : i32, i32
  }
  func.func @transform_3(%arg0: i32) -> (i32, i32) {
    %c0_i32 = arith.constant 0 : i32
    %c0_i32_0 = arith.constant 0 : i32
    %c0_i32_1 = arith.constant 0 : i32
    return %c0_i32, %c0_i32_0 : i32, i32
  }
  func.func @transform_4(%arg0: i32) -> (i32, i32) {
    %c0_i32 = arith.constant 0 : i32
    %c0_i32_0 = arith.constant 0 : i32
    %c0_i32_1 = arith.constant 0 : i32
    return %c0_i32, %c0_i32_0 : i32, i32
  }
  func.func @transform_5(%arg0: i32) -> (i32, i32) {
    %c0_i32 = arith.constant 0 : i32
    %c0_i32_0 = arith.constant 0 : i32
    %c0_i32_1 = arith.constant 0 : i32
    return %c0_i32, %c0_i32_0 : i32, i32
  }
  func.func @transform_6(%arg0: i32) -> (i32, i32) {
    %c0_i32 = arith.constant 0 : i32
    %c0_i32_0 = arith.constant 0 : i32
    %c0_i32_1 = arith.constant 0 : i32
    return %c0_i32, %c0_i32_0 : i32, i32
  }
  func.func @transform_7(%arg0: i32) -> (i32, i32) {
    %c0_i32 = arith.constant 0 : i32
    %c0_i32_0 = arith.constant 0 : i32
    %c0_i32_1 = arith.constant 0 : i32
    return %c0_i32, %c0_i32_0 : i32, i32
  }
  func.func @transform_8(%arg0: i32) -> (i32, i32) {
    %c0_i32 = arith.constant 0 : i32
    %c0_i32_0 = arith.constant 0 : i32
    %c0_i32_1 = arith.constant 0 : i32
    return %c0_i32, %c0_i32_0 : i32, i32
  }
  func.func @transform_9(%arg0: i32) -> (i32, i32) {
    %c0_i32 = arith.constant 0 : i32
    %c0_i32_0 = arith.constant 0 : i32
    %c0_i32_1 = arith.constant 0 : i32
    return %c0_i32, %c0_i32_0 : i32, i32
  }
  func.func @transform_10(%arg0: i32) -> (i32, i32) {
    %c0_i32 = arith.constant 0 : i32
    %c0_i32_0 = arith.constant 0 : i32
    %c0_i32_1 = arith.constant 0 : i32
    return %c0_i32, %c0_i32_0 : i32, i32
  }
  func.func @transform_11(%arg0: i32) -> (i32, i32) {
    %c0_i32 = arith.constant 0 : i32
    %c0_i32_0 = arith.constant 0 : i32
    return %arg0, %c0_i32 : i32, i32
  }
}

</mosaic_0001>

<bundles_post_ra>
// kernel: tpu_custom_call.1
= control target key start
LH: loop header
LB: loop body
LE: loop exit
PB: predicated region body
PF: predicated region fallthrough
CT: control target
= control target key end

     0   :  { %s2311_s0 = inlined_call_operand.hbm [shape: f32[16,128], index: 0, kind: input, shape index: {}]   ;;  %s2312_s1 = inlined_call_operand.hbm [shape: bf16[128,128], index: 1, kind: input, shape index: {}]   ;;  %s2313_s2 = inlined_call_operand.vmem [shape: f32[1,128], index: 2, kind: input, shape index: {}]   ;;  %s2314_s3 = inlined_call_operand.hbm [shape: bf16[128,128], index: 3, kind: input, shape index: {}]   ;;  %s2315_s4 = inlined_call_operand.vmem [shape: f32[1,128], index: 4, kind: input, shape index: {}]   ;;  %s2316_s5 = inlined_call_operand.hbm [shape: bf16[128,128], index: 5, kind: input, shape index: {}]   ;;  %s2317_s6 = inlined_call_operand.vmem [shape: f32[1,128], index: 6, kind: input, shape index: {}]   ;;  %s2318_s7 = inlined_call_operand.hbm [shape: bf16[128,128], index: 7, kind: input, shape index: {}]   ;;  %s2319_s8 = inlined_call_operand.vmem [shape: f32[1,128], index: 8, kind: input, shape index: {}]   ;;  %s2320_s9 = inlined_call_operand.hbm [shape: bf16[128,128], index: 9, kind: input, shape index: {}]   ;;  %s2321_s10 = inlined_call_operand.vmem [shape: f32[1,128], index: 10, kind: input, shape index: {}]   ;;  %s2322_s11 = inlined_call_operand.hbm [shape: f32[16,128], index: 11, kind: output, shape index: {}]  }
   0x1   :  { %2327 = sst [smem:[#allocation19_spill]] %s2312_s1 }
   0x2   :  { %2328 = sst [smem:[#allocation20_spill]] %s2319_s8 }
   0x3   :  { %2329 = sst [smem:[#allocation21_spill]] %s2321_s10 }
   0x4   :  { %2330 = sst [smem:[#allocation22_spill]] %s2322_s11 }
   0x5   :  { %16 = vsyncpa [#allocation3], 0 }
   0x6   :  { %18 = vsyncpa [#allocation3 + $0x1], 0 }
   0x7   :  { %19 = vsyncpa [#allocation6], 0 }
   0x8   :  { %20 = vsyncpa [#allocation9], 0 }
   0x9   :  { %21 = vsyncpa [#allocation12], 0 }
   0xa   :  { %22 = vsyncpa [#allocation4], 0 }
   0xb   :  { %24 = vsyncpa [#allocation4 + $0x1], 0  ;;  %s1928_s17 = smov 0   ;;  %s1930_s18 = smov 0  }
   0xc   :  { %s1932_s19 = smov 0   ;;  %s1934_s20 = smov 0  }
   0xd LB: > { %s1857_s21 = smov [#allocation5]   ;;  %s1949_s23 = sadd.s32 4294967295, %s1855_s20   ;;  %s1855_s20 = sphi %s1934_s20, %s2356_s20   ;;  %s1851_s19 = sphi %s1932_s19, %s2355_s19   ;;  %s1847_s18 = sphi %s1930_s18, %s2354_s18   ;;  %s1843_s17 = sphi %s1928_s17, %s2353_s17  }
   0xe   : > { %s309_s22 = sshll.u32 %s1857_s21, 4  ;;  %p1230_p0 = scmp.ge.s32.totalorder %s1855_s20, 1  ;;  %s1954_s22 = int_to_ptr.vmem [resolvable:$true] %s309_s22 }
   0xf   : > { %p2324_p1 = scmp.eq.s32.totalorder %s1949_s23, 0  ;;  %p297_p2 = scmp.lt.s32.totalorder %s1855_s20, 3 }
  0x10   : > { %s1858_s25 = smov [#allocation8]   ;;  %s1859_s28 = smov [#allocation7]  }
  0x11   : > { %p1956_p3 = pnand %p1230_p0, %p297_p2  ;;  %s341_s26 = sshll.u32 %s1858_s25, 4  ;;  %s1969_s26 = int_to_ptr.vmem [resolvable:$true] %s341_s26 }
  0x12   : > { %s325_s29 = sshll.u32 %s1859_s28, 4  ;;  %s2333_s1 = sld [smem:[#allocation19_spill]]  ;;  %s1971_s29 = int_to_ptr.vmem [resolvable:$true] %s325_s29 }
  0x13   : > { %s2331_s24 = scalar_select %p1956_p3, 1, 0 }
  0x14   : > { %p1470_p5 = pneg %p1956_p3 }
  0x16   : > { %p1965_p6 = pnand %p1470_p5, %p2324_p1 }
  0x18   : > { %s1607_s13 = scalar_lea.hbm %s2333_s1, 1024  ;;  %p1981_p8 = pneg %p1965_p6 }
  0x19   : > { %p1608_p7 = scmp.ne.s32.totalorder %s2333_s1, %s1607_s13  ;;  %p1614_p11 = scmp.lt.u32.totalorder %s1607_s13, %s2333_s1 }
  0x1b   : > { %p1610_p9 = pnand %p1981_p8, %p1608_p7 }
  0x1d   : > { %p1611_p10 = pneg %p1610_p9 }
  0x1f   : > { %p1616_p12 = pnand %p1614_p11, %p1611_p10 }
  0x21   : > { %1619 = shalt.err (!%p1616_p12)
}
  0x22   : > { %s1620_s28 = scalar_lea.vmem %s1954_s22, 1024  ;;  %p1628_p5 = scmp.lt.s32.totalorder %s1954_s22, %s1954_s22 }
  0x23   : > { %p1621_p13 = scmp.ne.s32.totalorder %s1954_s22, %s1620_s28  ;;  %p1629_p4 = scmp.lt.s32.totalorder %s1620_s28, %s1620_s28 }
  0x25   : > { %p1623_p0 = pnand %p1621_p13, %p1981_p8  ;;  %p1630_p7 = por %p1629_p4, %p1628_p5 }
  0x27   : > { %p1624_p2 = pneg %p1623_p0 }
  0x29   : > { %p1631_p9 = pnand %p1630_p7, %p1624_p2 }
  0x2b   : > { %1634 = shalt.err (!%p1631_p9)
}
  0x2c   : > { %s1860_s30 = smov 64   ;;  %s1861_s12 = smov 4  }
  0x2d   : > { %1473 = dma.hbm_to_vmem [thread:$0]  (!%p1965_p6), %s2333_s1, 1024, %s1954_s22, [#allocation6], %s1860_s30, %s1860_s30, %s1861_s12  }
  0x2e   : > { %s1635_s25 = scalar_lea.hbm %s2316_s5, 1024 }
  0x2f   : > { %p1636_p4 = scmp.ne.s32.totalorder %s2316_s5, %s1635_s25  ;;  %p1642_p12 = scmp.lt.u32.totalorder %s1635_s25, %s2316_s5 }
  0x31   : > { %p1638_p10 = pnand %p1636_p4, %p1981_p8 }
  0x33   : > { %p1639_p11 = pneg %p1638_p10 }
  0x35   : > { %p1644_p13 = pnand %p1642_p12, %p1639_p11 }
  0x37   : > { %1647 = shalt.err (!%p1644_p13)
}
  0x38   : > { %s1648_s22 = scalar_lea.vmem %s1969_s26, 1024  ;;  %p1656_p7 = scmp.lt.s32.totalorder %s1969_s26, %s1969_s26 }
  0x39   : > { %p1649_p0 = scmp.ne.s32.totalorder %s1969_s26, %s1648_s22  ;;  %p1657_p9 = scmp.lt.s32.totalorder %s1648_s22, %s1648_s22 }
  0x3b   : > { %p1651_p2 = pnand %p1649_p0, %p1981_p8  ;;  %p1658_p4 = por %p1657_p9, %p1656_p7 }
  0x3d   : > { %p1652_p5 = pneg %p1651_p2 }
  0x3f   : > { %p1659_p10 = pnand %p1658_p4, %p1652_p5 }
  0x41   : > { %1662 = shalt.err (!%p1659_p10)
}
  0x42   : > { %1479 = dma.hbm_to_vmem [thread:$0]  (!%p1965_p6), %s2316_s5, 1024, %s1969_s26, [#allocation9], %s1860_s30, %s1860_s30, %s1861_s12  }
  0x43   : > { %s1663_s14 = scalar_lea.hbm %s2314_s3, 1024 }
  0x44   : > { %p1664_p11 = scmp.ne.s32.totalorder %s2314_s3, %s1663_s14  ;;  %p1670_p0 = scmp.lt.u32.totalorder %s1663_s14, %s2314_s3 }
  0x46   : > { %p1666_p12 = pnand %p1664_p11, %p1981_p8 }
  0x48   : > { %p1667_p13 = pneg %p1666_p12 }
  0x4a   : > { %p1672_p2 = pnand %p1670_p0, %p1667_p13 }
  0x4c   : > { %1675 = shalt.err (!%p1672_p2)
}
  0x4d   : > { %s1676_s26 = scalar_lea.vmem %s1971_s29, 1024  ;;  %p1684_p4 = scmp.lt.s32.totalorder %s1971_s29, %s1971_s29 }
  0x4e   : > { %p1677_p5 = scmp.ne.s32.totalorder %s1971_s29, %s1676_s26  ;;  %p1685_p10 = scmp.lt.s32.totalorder %s1676_s26, %s1676_s26 }
  0x50   : > { %p1679_p7 = pnand %p1677_p5, %p1981_p8  ;;  %p1686_p11 = por %p1685_p10, %p1684_p4 }
  0x52   : > { %p1680_p9 = pneg %p1679_p7 }
  0x54   : > { %p1687_p12 = pnand %p1686_p11, %p1680_p9 }
  0x56   : > { %1690 = shalt.err (!%p1687_p12)
}
  0x57   : > { %1476 = dma.hbm_to_vmem [thread:$0]  (!%p1965_p6), %s2314_s3, 1024, %s1971_s29, [#allocation6], %s1860_s30, %s1860_s30, %s1861_s12  }
  0x58   : > { %s1862_s10 = smov [#allocation10]   ;;  %s1863_s13 = smov [#allocation11]  }
  0x59   : > { %s357_s11 = sshll.u32 %s1862_s10, 4  ;;  %s373_s14 = sshll.u32 %s1863_s13, 4  ;;  %s358_s11 = int_to_ptr.vmem [resolvable:$true] %s357_s11  ;;  %s374_s14 = int_to_ptr.vmem [resolvable:$true] %s373_s14 }
  0x5a   : > { %s1691_s25 = scalar_lea.hbm %s2318_s7, 1024 }
  0x5b   : > { %p1692_p13 = scmp.ne.s32.totalorder %s2318_s7, %s1691_s25  ;;  %p1698_p5 = scmp.lt.u32.totalorder %s1691_s25, %s2318_s7 }
  0x5d   : > { %p1694_p0 = pnand %p1692_p13, %p1981_p8 }
  0x5f   : > { %p1695_p2 = pneg %p1694_p0 }
  0x61   : > { %p1700_p7 = pnand %p1698_p5, %p1695_p2 }
  0x63   : > { %1703 = shalt.err (!%p1700_p7)
}
  0x64   : > { %s1704_s29 = scalar_lea.vmem %s358_s11, 1024  ;;  %p1712_p11 = scmp.lt.s32.totalorder %s358_s11, %s358_s11 }
  0x65   : > { %p1705_p9 = scmp.ne.s32.totalorder %s358_s11, %s1704_s29  ;;  %p1713_p12 = scmp.lt.s32.totalorder %s1704_s29, %s1704_s29 }
  0x67   : > { %p1707_p4 = pnand %p1705_p9, %p1981_p8  ;;  %p1714_p1 = por %p1713_p12, %p1712_p11 }
  0x69   : > { %p1708_p10 = pneg %p1707_p4 }
  0x6b   : > { %p1715_p3 = pnand %p1714_p1, %p1708_p10 }
  0x6d   : > { %1718 = shalt.err (!%p1715_p3)
}
  0x6e   : > { %1482 = dma.hbm_to_vmem [thread:$0]  (!%p1965_p6), %s2318_s7, 1024, %s358_s11, [#allocation9], %s1860_s30, %s1860_s30, %s1861_s12  }
  0x6f   : > { %s1719_s15 = scalar_lea.hbm %s2320_s9, 1024 }
  0x70   : > { %p1720_p1 = scmp.ne.s32.totalorder %s2320_s9, %s1719_s15  ;;  %p1726_p0 = scmp.lt.u32.totalorder %s1719_s15, %s2320_s9 }
  0x72   : > { %p1722_p3 = pnand %p1720_p1, %p1981_p8 }
  0x74   : > { %p1723_p13 = pneg %p1722_p3 }
  0x76   : > { %p1728_p2 = pnand %p1726_p0, %p1723_p13 }
  0x78   : > { %1731 = shalt.err (!%p1728_p2)
}
  0x79   : > { %s1732_s22 = scalar_lea.vmem %s374_s14, 1024  ;;  %p1740_p4 = scmp.lt.s32.totalorder %s374_s14, %s374_s14 }
  0x7a   : > { %p1733_p5 = scmp.ne.s32.totalorder %s374_s14, %s1732_s22  ;;  %p1741_p10 = scmp.lt.s32.totalorder %s1732_s22, %s1732_s22 }
  0x7c   : > { %p1735_p7 = pnand %p1733_p5, %p1981_p8  ;;  %p1742_p11 = por %p1741_p10, %p1740_p4 }
  0x7e   : > { %p1736_p9 = pneg %p1735_p7 }
  0x80   : > { %p1743_p12 = pnand %p1742_p11, %p1736_p9 }
  0x82   : > { %1746 = shalt.err (!%p1743_p12)
}
  0x83   : > { %1485 = dma.hbm_to_vmem [thread:$0]  (!%p1965_p6), %s2320_s9, 1024, %s374_s14, [#allocation12], %s1860_s30, %s1860_s30, %s1861_s12  }
  0x84   : > { %s1229_s27 = sadd.s32 4294967294, %s1855_s20   ;;  %s2101_s16 = sadd.s32 1, %s1855_s20  }
  0x85   : > { %s37_s1 = sadd.s32 1, %s1851_s19  ;;  %s34_s8 = ssub.s32 %s1855_s20, %s2101_s16 }
  0x86   : > { %p44_p8 = scmp.ne.s32.totalorder %s1851_s19, %s1847_s18  ;;  %p35_p1 = scmp.eq.s32.totalorder %s34_s8, 0 }
  0x87   : > { %p45_p3 = scmp.eq.s32.totalorder %s1855_s20, 0  ;;  %p50_p13 = scmp.ne.s32.totalorder %s1847_s18, %s1843_s17 }
  0x88   : > { %p284_p0 = scmp.eq.s32.totalorder %s1949_s23, 1  ;;  %p2335_p5 = scmp.eq.s32.totalorder %s1949_s23, 0 }
  0x89   : > { %s2113_s10 = scalar_select %p35_p1, %s1851_s19, %s37_s1  }
  0x8a   : > { %p46_p2 = por %p45_p3, %p44_p8  ;;  %p2117_p7 = por %p2335_p5, %p50_p13 }
  0x8b   : > { %p2121_p6 = por %p284_p0, %p44_p8  ;;  %p290_p9 = scmp.eq.s32.totalorder %s1229_s27, 1 }
  0x8c   : > { %p1499_p4 = scmp.lt.s32.totalorder %s1855_s20, 2  ;;  %s390_s12 = sand.u32 1, %s1851_s19  }
  0x8d   : > { %s2337_s30 = scalar_select %p2121_p6, 1, 0 }
  0x8e   : > { %p2127_p10 = por %p290_p9, %p50_p13  ;;  %s1237_s15 = sshll.u32 %s390_s12, 3 }
  0x8f   : > { %s1238_s21 = sshll.u32 %s1855_s20, 7  ;;  %s394_s22 = scalar_lea.vmem [#allocation2], %s1237_s15 }
  0x90   : > { %s2338_s14 = scalar_select %p2127_p10, 1, 0 }
  0x91   : > { %s2135_s26 = scalar_lea.hbm %s2311_s0, %s1238_s21  ;;  %s401_s11 = sshll.u32 %s394_s22, 4  ;;  %s2141_s11 = int_to_ptr.vmem [resolvable:$true] %s401_s11 }
  0x92   : > { %p2137_p11 = pnand %p1499_p4, %p46_p2  ;;  %s391_s27 = scalar_lea.sflag [#allocation3], %s390_s12 }
  0x93   : > { %s1747_s1 = scalar_lea.hbm %s2135_s26, 128  ;;  %s1752_s21 = scalar_lea.hbm %s2311_s0, 256 }
  0x94   : > { %p1748_p12 = scmp.ne.s32.totalorder %s2135_s26, %s1747_s1  ;;  %p1749_p8 = pneg %p2137_p11 }
  0x95   : > { %p1753_p13 = scmp.lt.u32.totalorder %s2135_s26, %s2311_s0  ;;  %p1754_p0 = scmp.lt.u32.totalorder %s1752_s21, %s1747_s1 }
  0x96   : > { %p1750_p1 = pnand %p1749_p8, %p1748_p12  ;;  %p1756_p5 = scmp.lt.u32.totalorder %s1747_s1, %s2135_s26 }
  0x97   : > { %p1755_p2 = por %p1754_p0, %p1753_p13 }
  0x98   : > { %p1751_p3 = pneg %p1750_p1 }
  0x99   : > { %p1757_p9 = por %p1756_p5, %p1755_p2 }
  0x9b   : > { %p1758_p4 = pnand %p1757_p9, %p1751_p3 }
  0x9d   : > { %1761 = shalt.err (!%p1758_p4)
}
  0x9e   : > { %s1762_s12 = scalar_lea.vmem %s2141_s11, 128  ;;  %s1864_s22 = smov [#allocation2]  }
  0x9f   : > { %p1763_p12 = scmp.ne.s32.totalorder %s2141_s11, %s1762_s12  ;;  %s1767_s8 = sshll.u32 %s1864_s22, 4  ;;  %s1768_s8 = int_to_ptr.vmem [resolvable:$false] %s1767_s8 }
  0xa0   : > { %s1769_s15 = scalar_lea.vmem %s1768_s8, 256  ;;  %p1770_p6 = scmp.lt.s32.totalorder %s2141_s11, %s1768_s8 }
  0xa1   : > { %p1765_p1 = pnand %p1763_p12, %p1749_p8  ;;  %p1771_p13 = scmp.lt.s32.totalorder %s1769_s15, %s1762_s12 }
  0xa3   : > { %p1766_p10 = pneg %p1765_p1  ;;  %p1772_p0 = por %p1771_p13, %p1770_p6 }
  0xa5   : > { %p1773_p2 = pnand %p1772_p0, %p1766_p10 }
  0xa7   : > { %1776 = shalt.err (!%p1773_p2)
}
  0xa8   : > { %1489 = dma.hbm_to_vmem [thread:$0]  (!%p2137_p11), %s2135_s26, 128, %s2141_s11, %s391_s27  }
  0xa9   : > { %p2340_p3 = scmp.ne.s32.totalorder %s2331_s24, 0 }
  0xaa   : > { %s2171_s1 = sand.u32 (!%p2340_p3), 1, %s1847_s18  }
  0xab   : > { %410 = sbr.rel (%p2340_p3) target bundleno = 1502 (0x5de), region = 64  ;;  %s1240_s21 = sshll.u32 (!%p2340_p3), %s2171_s1, 3 }
  0xac   : > { %s413_s25 = scalar_lea.sflag (!%p2340_p3), [#allocation3], %s2171_s1  ;;  %s2177_s28 = scalar_lea.vmem (!%p2340_p3), [#allocation2], %s1240_s21 }
  0xb2   : > { %1822 = dma.done.wait (%p2117_p7), %s413_s25, 128  }
  0xb3   : > { %1824 = vsyncadd (%p2117_p7), %s413_s25, 4294967168  ;;  %p2341_p6 = scmp.eq.s32.totalorder %s1949_s23, 0 }
  0xb5   : > { %1826 = dma.done.wait (%p2341_p6), [#allocation6], 2048   ;;  %p2342_p10 = pmov %p2341_p6 }
  0xb6   : > { %p2343_p11 = pmov %p2341_p6 }
  0xb7   : > { %1828 = vsyncadd (%p2342_p10), [#allocation6], 4294965248 }
  0xb8   : > { %1830 = dma.done.wait (%p2343_p11), [#allocation9], 2048   ;;  %p2344_p8 = pmov %p2341_p6 }
  0xb9   : > { %p2345_p5 = pmov %p2341_p6 }
  0xba   : > { %1832 = vsyncadd (%p2344_p8), [#allocation9], 4294965248 }
  0xbb   : > { %1834 = dma.done.wait (%p2345_p5), [#allocation12], 1024   ;;  %p2346_p9 = pmov %p2345_p5 }
  0xbc   : > { %v1865_v0 = vmov 0.0   ;;  %vm1866_vm0 = vmmov 0   ;;  %v1547_v1 = vld [vmem:[#allocation5] sm:$0xff]   ;;  %v1548_v2 = vld [vmem:[#allocation5 + $0x8] sm:$0xff]   ;;  %v1549_v3 = vld [vmem:[#allocation5 + $0x10] sm:$0xff]   ;;  %s2347_s8 = sld [smem:[#allocation20_spill]] }
  0xbd   : > { %1836 = vsyncadd (%p2346_p9), [#allocation12], 4294966272  ;;  %1346 = vmatprep.subr.bf16.mxu0 %v1865_v0  ;;  %1362 = vmatprep.mubr.msk.bf16.mxu0 %vm1866_vm0, %v1865_v0  ;;  %v1550_v4 = vld [vmem:[#allocation5 + $0x18] sm:$0xff]   ;;  %v1551_v5 = vld [vmem:[#allocation5 + $0x20] sm:$0xff]   ;;  %s1298_s24 = sshll.u32 %s1949_s23, 7  ;;  %s474_s13 = scalar_lea.vmem [#allocation13], %s1240_s21 }
  0xbe   : > { %1366 = vmatprep.subr.bf16.mxu1 %v1865_v0  ;;  %1382 = vmatprep.mubr.msk.bf16.mxu1 %vm1866_vm0, %v1865_v0  ;;  %v1552_v6 = vld [vmem:[#allocation5 + $0x28] sm:$0xff]   ;;  %v1553_v7 = vld [vmem:[#allocation5 + $0x30] sm:$0xff]   ;;  %v1554_v8 = vld [vmem:[#allocation5 + $0x38] sm:$0xff]   ;;  %s1111_s26 = sshll.u32 %s474_s13, 4  ;;  %s2349_s27 = sld [smem:[#allocation22_spill]]  ;;  %s2269_s26 = int_to_ptr.vmem [resolvable:$true] %s1111_s26 }
  0xbf   : > { %1347 = vmatpush3.bf16.msra.mxu0 %v1547_v1  ;;  %v476_v9 = vld [vmem:[%s2177_s28] sm:$0xff]  ;;  %v1555_v11 = vld [vmem:[#allocation7] sm:$0xff]   ;;  %v1556_v12 = vld [vmem:[#allocation7 + $0x8] sm:$0xff]   ;;  %s2348_s28 = sld [smem:[#allocation21_spill]]  ;;  %s1098_s22 = scalar_lea.sflag [#allocation4], %s2171_s1 }
  0xc0   : > { %1348 = vmatprep.subr.bf16.mxu0 %v1865_v0  ;;  %v477_v10 = vpack.c.bf16 %v476_v9, %v476_v9  ;;  %1367 = vmatpush3.bf16.msra.mxu1 %v1555_v11  ;;  %v1557_v13 = vld [vmem:[#allocation7 + $0x10] sm:$0xff]   ;;  %v1558_v14 = vld [vmem:[#allocation7 + $0x18] sm:$0xff]   ;;  %v1559_v15 = vld [vmem:[#allocation7 + $0x20] sm:$0xff]   ;;  %p2350_p4 = scmp.ne.s32.totalorder %s2337_s30, 0  ;;  %s1867_s23 = smov [#allocation13]  }
  0xc1   : > { %1368 = vmatprep.subr.bf16.mxu1 %v1865_v0  ;;  %v1560_v16 = vld [vmem:[#allocation7 + $0x28] sm:$0xff]   ;;  %v1561_v17 = vld [vmem:[#allocation7 + $0x30] sm:$0xff]   ;;  %v1562_v18 = vld [vmem:[#allocation7 + $0x38] sm:$0xff]   ;;  %s1781_s21 = sshll.u32 %s1867_s23, 4  ;;  %s1782_s21 = int_to_ptr.vmem [resolvable:$false] %s1781_s21 }
  0xc2   : > { %v1247_v19 = vld [vmem:[%s2313_s2] ss:$0 sm:$0xff]  ;;  %v1563_v36 = vld [vmem:[#allocation8] sm:$0xff]   ;;  %v1564_v37 = vld [vmem:[#allocation8 + $0x8] sm:$0xff]   ;;  %s1783_s15 = scalar_lea.vmem %s1782_s21, 256  ;;  %p1784_p13 = scmp.lt.s32.totalorder %s2269_s26, %s1782_s21 }
  0xc3   : > { %1349 = vmatpush3.bf16.msra.mxu0 %v1548_v2  ;;  %v1565_v38 = vld [vmem:[#allocation8 + $0x10] sm:$0xff]   ;;  %v1566_v39 = vld [vmem:[#allocation8 + $0x18] sm:$0xff]   ;;  %v1567_v40 = vld [vmem:[#allocation8 + $0x20] sm:$0xff]  }
  0xc4   : > { %1350 = vmatprep.subr.bf16.mxu0 %v1865_v0  ;;  %1369 = vmatpush3.bf16.msra.mxu1 %v1556_v12  ;;  %v1568_v41 = vld [vmem:[#allocation8 + $0x28] sm:$0xff]   ;;  %v1569_v42 = vld [vmem:[#allocation8 + $0x30] sm:$0xff]   ;;  %v1570_v43 = vld [vmem:[#allocation8 + $0x38] sm:$0xff]   ;;  %s2267_s12 = scalar_lea.hbm %s2349_s27, %s1298_s24 }
  0xc5   : > { %1370 = vmatprep.subr.bf16.mxu1 %v1865_v0  ;;  %v1257_v44 = vld [vmem:[%s2315_s4] ss:$0 sm:$0xff]  ;;  %v1571_v61 = vld [vmem:[#allocation10] sm:$0xff]   ;;  %v1572_v62 = vld [vmem:[#allocation10 + $0x8] sm:$0xff]  }
  0xc6   : > { %v1573_v63 = vld [vmem:[#allocation10 + $0x10] sm:$0xff]   ;;  %v1574_v1 = vld [vmem:[#allocation10 + $0x18] sm:$0xff]   ;;  %v1575_v2 = vld [vmem:[#allocation10 + $0x20] sm:$0xff]  }
  0xc7   : > { %1351 = vmatpush3.bf16.msra.mxu0 %v1549_v3  ;;  %v1576_v3 = vld [vmem:[#allocation10 + $0x28] sm:$0xff]  }
  0xc8   : > { %1352 = vmatprep.subr.bf16.mxu0 %v1865_v0  ;;  %1371 = vmatpush3.bf16.msra.mxu1 %v1557_v13 }
  0xc9   : > { %1372 = vmatprep.subr.bf16.mxu1 %v1865_v0 }
  0xcb   : > { %1353 = vmatpush3.bf16.msra.mxu0 %v1550_v4  ;;  %v1577_v4 = vld [vmem:[#allocation10 + $0x30] sm:$0xff]  }
  0xcc   : > { %1354 = vmatprep.subr.bf16.mxu0 %v1865_v0  ;;  %1373 = vmatpush3.bf16.msra.mxu1 %v1558_v14 }
  0xcd   : > { %1374 = vmatprep.subr.bf16.mxu1 %v1865_v0 }
  0xcf   : > { %1355 = vmatpush3.bf16.msra.mxu0 %v1551_v5  ;;  %v1578_v5 = vld [vmem:[#allocation10 + $0x38] sm:$0xff]  }
  0xd0   : > { %1356 = vmatprep.subr.bf16.mxu0 %v1865_v0  ;;  %1375 = vmatpush3.bf16.msra.mxu1 %v1559_v15 }
  0xd1   : > { %1376 = vmatprep.subr.bf16.mxu1 %v1865_v0 }
  0xd3   : > { %1357 = vmatpush3.bf16.msra.mxu0 %v1552_v6  ;;  %v1267_v6 = vld [vmem:[%s2317_s6] ss:$0 sm:$0xff] }
  0xd4   : > { %1358 = vmatprep.subr.bf16.mxu0 %v1865_v0  ;;  %1377 = vmatpush3.bf16.msra.mxu1 %v1560_v16 }
  0xd5   : > { %1378 = vmatprep.subr.bf16.mxu1 %v1865_v0 }
  0xd7   : > { %1359 = vmatpush3.bf16.msra.mxu0 %v1553_v7 }
  0xd8   : > { %1360 = vmatprep.subr.bf16.mxu0 %v1865_v0  ;;  %1379 = vmatpush3.bf16.msra.mxu1 %v1561_v17 }
  0xd9   : > { %1380 = vmatprep.subr.bf16.mxu1 %v1865_v0 }
  0xdb   : > { %1361 = vmatpush3.bf16.msra.mxu0 %v1554_v8 }
  0xdc   : > { %1386 = vmatprep.subr.bf16.mxu0 %v1865_v0  ;;  %1381 = vmatpush3.bf16.msra.mxu1 %v1562_v18 }
  0xdd   : > { %1406 = vmatprep.subr.bf16.mxu1 %v1865_v0 }
  0xde   : > { %1363 = vmatmul.mubr.bf16.vlgmr.msra.gmra.mrb[0].mxu0 %v477_v10 }
  0xdf   : > { %1402 = vmatprep.mubr.msk.bf16.mxu0 %vm1866_vm0, %v1865_v0  ;;  %1387 = vmatpush3.bf16.msra.mxu0 %v1563_v36 }
  0xe0   : > { %1388 = vmatprep.subr.bf16.mxu0 %v1865_v0 }
  0xe3   : > { %1389 = vmatpush3.bf16.msra.mxu0 %v1564_v37 }
  0xe4   : > { %1390 = vmatprep.subr.bf16.mxu0 %v1865_v0 }
  0xe7   : > { %1391 = vmatpush3.bf16.msra.mxu0 %v1565_v38 }
  0xe8   : > { %1392 = vmatprep.subr.bf16.mxu0 %v1865_v0 }
  0xeb   : > { %1393 = vmatpush3.bf16.msra.mxu0 %v1566_v39 }
  0xec   : > { %1394 = vmatprep.subr.bf16.mxu0 %v1865_v0 }
  0xef   : > { %1395 = vmatpush3.bf16.msra.mxu0 %v1567_v40 }
  0xf0   : > { %1396 = vmatprep.subr.bf16.mxu0 %v1865_v0 }
  0xf3   : > { %1397 = vmatpush3.bf16.msra.mxu0 %v1568_v41 }
  0xf4   : > { %1398 = vmatprep.subr.bf16.mxu0 %v1865_v0 }
  0xf7   : > { %1399 = vmatpush3.bf16.msra.mxu0 %v1569_v42 }
  0xf8   : > { %1400 = vmatprep.subr.bf16.mxu0 %v1865_v0 }
  0xfb   : > { %1401 = vmatpush3.bf16.msra.mxu0 %v1570_v43 }
  0xfc   : > { %1426 = vmatprep.subr.bf16.mxu0 %v1865_v0 }
 0x1b1   : > { %v583_v20 = vpop.f32.mrb[0].mxu0 }
 0x1b2   : > { %v584_v21 = vadd.f32 %v1247_v19, %v583_v20  ;;  %v1364_v22 = vpop.f32.mrb[1].mxu0 }
 0x1b3   : > { %v586_v23 = vpop.f32.mrb[2].mxu0 }
 0x1b4   : > { %v589_v24 = vmul.f32 %v584_v21, %v584_v21  ;;  %v1365_v25 = vpop.f32.mrb[3].mxu0  ;;  %v1579_v23 = vld [vmem:[#allocation11] sm:$0xff]  }
 0x1b5   : > { %v1581_v25 = vld [vmem:[#allocation11 + $0x10] sm:$0xff]  }
 0x1b6   : > { %v590_v26 = vmul.f32 0.071354814, %v589_v24  ;;  %v1580_v24 = vld [vmem:[#allocation11 + $0x8] sm:$0xff]  }
 0x1b8   : > { %v591_v27 = vadd.f32 1.5957692, %v590_v26  ;;  %v1582_v26 = vld [vmem:[#allocation11 + $0x18] sm:$0xff]  }
 0x1ba   : > { %v592_v28 = vmul.f32 %v591_v27, %v584_v21  ;;  %v1583_v27 = vld [vmem:[#allocation11 + $0x20] sm:$0xff]  }
 0x1bc   : > { %v1256_v29 = vmul.f32 -1.442695, %v592_v28  ;;  %v1584_v28 = vld [vmem:[#allocation11 + $0x28] sm:$0xff]  }
 0x1be   : > { %1587 = vpow2.f32 %v1256_v29  ;;  %v1585_v29 = vld [vmem:[#allocation11 + $0x30] sm:$0xff]  }
 0x1c8   : > { %v1588_v30 = vpop.eup %1587 }
 0x1c9   : > { %v596_v31 = vadd.f32 1.0, %v1588_v30  ;;  %v1586_v30 = vld [vmem:[#allocation11 + $0x38] sm:$0xff]  }
 0x1cb   : > { %1589 = vrcp.f32 %v596_v31  ;;  %v1277_v31 = vld [vmem:[%s2347_s8] ss:$0 sm:$0xff]  ;;  %s1777_s8 = scalar_lea.vmem %s2269_s26, 128 }
 0x1cc   : > { %p1778_p7 = scmp.ne.s32.totalorder %s2269_s26, %s1777_s8  ;;  %p1785_p0 = scmp.lt.s32.totalorder %s1783_s15, %s1777_s8 }
 0x1ce   : > { %p1779_p12 = pnand %p1778_p7, %p2350_p4  ;;  %p1786_p2 = por %p1785_p0, %p1784_p13 }
 0x1d0   : > { %p1780_p1 = pneg %p1779_p12 }
 0x1d2   : > { %p1787_p3 = pnand %p1786_p2, %p1780_p1 }
 0x1d5   : > { %v1590_v32 = vpop.eup %1589 }
 0x1d6   : > { %v599_v33 = vmul.f32 %v1590_v32, %v584_v21 }
 0x1d8   : > { %v600_v34 = vadd.f32 %v599_v33, %v476_v9 }
 0x1da   : > { %v601_v35 = vpack.c.bf16 %v600_v34, %v600_v34 }
 0x1dc   : > { %1383 = vmatmul.mubr.bf16.vlgmr.msra.gmra.mrb[0].mxu1 %v601_v35 }
 0x1dd   : > { %1422 = vmatprep.mubr.msk.bf16.mxu1 %vm1866_vm0, %v1865_v0  ;;  %1407 = vmatpush3.bf16.msra.mxu1 %v1571_v61 }
 0x1de   : > { %1408 = vmatprep.subr.bf16.mxu1 %v1865_v0 }
 0x1e1   : > { %1409 = vmatpush3.bf16.msra.mxu1 %v1572_v62 }
 0x1e2   : > { %1410 = vmatprep.subr.bf16.mxu1 %v1865_v0 }
 0x1e5   : > { %1411 = vmatpush3.bf16.msra.mxu1 %v1573_v63 }
 0x1e6   : > { %1412 = vmatprep.subr.bf16.mxu1 %v1865_v0 }
 0x1e9   : > { %1413 = vmatpush3.bf16.msra.mxu1 %v1574_v1 }
 0x1ea   : > { %1414 = vmatprep.subr.bf16.mxu1 %v1865_v0 }
 0x1ed   : > { %1415 = vmatpush3.bf16.msra.mxu1 %v1575_v2 }
 0x1ee   : > { %1416 = vmatprep.subr.bf16.mxu1 %v1865_v0 }
 0x1f1   : > { %1417 = vmatpush3.bf16.msra.mxu1 %v1576_v3 }
 0x1f2   : > { %1418 = vmatprep.subr.bf16.mxu1 %v1865_v0 }
 0x1f5   : > { %1419 = vmatpush3.bf16.msra.mxu1 %v1577_v4 }
 0x1f6   : > { %1420 = vmatprep.subr.bf16.mxu1 %v1865_v0 }
 0x1f9   : > { %1421 = vmatpush3.bf16.msra.mxu1 %v1578_v5 }
 0x2af   : > { %v707_v45 = vpop.f32.mrb[0].mxu1 }
 0x2b0   : > { %v708_v46 = vadd.f32 %v1257_v44, %v707_v45  ;;  %v1384_v47 = vpop.f32.mrb[1].mxu1 }
 0x2b1   : > { %v710_v48 = vpop.f32.mrb[2].mxu1  ;;  %v1287_v47 = vld [vmem:[%s2348_s28] ss:$0 sm:$0xff] }
 0x2b2   : > { %v713_v49 = vmul.f32 %v708_v46, %v708_v46  ;;  %v1385_v50 = vpop.f32.mrb[3].mxu1 }
 0x2b4   : > { %v714_v51 = vmul.f32 0.071354814, %v713_v49 }
 0x2b6   : > { %v715_v52 = vadd.f32 1.5957692, %v714_v51 }
 0x2b8   : > { %v716_v53 = vmul.f32 %v715_v52, %v708_v46 }
 0x2ba   : > { %v1266_v54 = vmul.f32 -1.442695, %v716_v53 }
 0x2bc   : > { %1591 = vpow2.f32 %v1266_v54 }
 0x2c6   : > { %v1592_v55 = vpop.eup %1591 }
 0x2c7   : > { %v720_v56 = vadd.f32 1.0, %v1592_v55 }
 0x2c9   : > { %1593 = vrcp.f32 %v720_v56 }
 0x2d3   : > { %v1594_v57 = vpop.eup %1593 }
 0x2d4   : > { %v723_v58 = vmul.f32 %v1594_v57, %v708_v46 }
 0x2d6   : > { %v724_v59 = vadd.f32 %v723_v58, %v600_v34 }
 0x2d8   : > { %v725_v60 = vpack.c.bf16 %v724_v59, %v724_v59 }
 0x2da   : > { %1403 = vmatmul.mubr.bf16.vlgmr.msra.gmra.mrb[4].mxu0 %v725_v60 }
 0x2db   : > { %1442 = vmatprep.mubr.msk.bf16.mxu0 %vm1866_vm0, %v1865_v0  ;;  %1427 = vmatpush3.bf16.msra.mxu0 %v1579_v23 }
 0x2dc   : > { %1428 = vmatprep.subr.bf16.mxu0 %v1865_v0 }
 0x2df   : > { %1429 = vmatpush3.bf16.msra.mxu0 %v1580_v24 }
 0x2e0   : > { %1430 = vmatprep.subr.bf16.mxu0 %v1865_v0 }
 0x2e3   : > { %1431 = vmatpush3.bf16.msra.mxu0 %v1581_v25 }
 0x2e4   : > { %1432 = vmatprep.subr.bf16.mxu0 %v1865_v0 }
 0x2e7   : > { %1433 = vmatpush3.bf16.msra.mxu0 %v1582_v26 }
 0x2e8   : > { %1434 = vmatprep.subr.bf16.mxu0 %v1865_v0 }
 0x2eb   : > { %1435 = vmatpush3.bf16.msra.mxu0 %v1583_v27 }
 0x2ec   : > { %1436 = vmatprep.subr.bf16.mxu0 %v1865_v0 }
 0x2ef   : > { %1437 = vmatpush3.bf16.msra.mxu0 %v1584_v28 }
 0x2f0   : > { %1438 = vmatprep.subr.bf16.mxu0 %v1865_v0 }
 0x2f3   : > { %1439 = vmatpush3.bf16.msra.mxu0 %v1585_v29 }
 0x2f4   : > { %1440 = vmatprep.subr.bf16.mxu0 %v1865_v0 }
 0x2f7   : > { %1441 = vmatpush3.bf16.msra.mxu0 %v1586_v30 }
 0x3ad   : > { %v831_v7 = vpop.f32.mrb[4].mxu0 }
 0x3ae   : > { %v832_v8 = vadd.f32 %v1267_v6, %v831_v7  ;;  %v1404_v9 = vpop.f32.mrb[5].mxu0 }
 0x3af   : > { %v834_v10 = vpop.f32.mrb[6].mxu0 }
 0x3b0   : > { %v837_v11 = vmul.f32 %v832_v8, %v832_v8  ;;  %v1405_v12 = vpop.f32.mrb[7].mxu0 }
 0x3b2   : > { %v838_v13 = vmul.f32 0.071354814, %v837_v11 }
 0x3b4   : > { %v839_v14 = vadd.f32 1.5957692, %v838_v13 }
 0x3b6   : > { %v840_v15 = vmul.f32 %v839_v14, %v832_v8 }
 0x3b8   : > { %v1276_v16 = vmul.f32 -1.442695, %v840_v15 }
 0x3ba   : > { %1595 = vpow2.f32 %v1276_v16 }
 0x3c4   : > { %v1596_v17 = vpop.eup %1595 }
 0x3c5   : > { %v844_v18 = vadd.f32 1.0, %v1596_v17 }
 0x3c7   : > { %1597 = vrcp.f32 %v844_v18 }
 0x3d1   : > { %v1598_v19 = vpop.eup %1597 }
 0x3d2   : > { %v847_v20 = vmul.f32 %v1598_v19, %v832_v8 }
 0x3d4   : > { %v848_v21 = vadd.f32 %v847_v20, %v724_v59 }
 0x3d6   : > { %v849_v22 = vpack.c.bf16 %v848_v21, %v848_v21 }
 0x3d8   : > { %1423 = vmatmul.mubr.bf16.vlgmr.msra.gmra.mrb[4].mxu1 %v849_v22 }
 0x4ab   : > { %v955_v32 = vpop.f32.mrb[4].mxu1 }
 0x4ac   : > { %v956_v33 = vadd.f32 %v1277_v31, %v955_v32  ;;  %v1424_v34 = vpop.f32.mrb[5].mxu1 }
 0x4ad   : > { %v958_v35 = vpop.f32.mrb[6].mxu1 }
 0x4ae   : > { %v961_v36 = vmul.f32 %v956_v33, %v956_v33  ;;  %v1425_v37 = vpop.f32.mrb[7].mxu1 }
 0x4b0   : > { %v962_v38 = vmul.f32 0.071354814, %v961_v36 }
 0x4b2   : > { %v963_v39 = vadd.f32 1.5957692, %v962_v38 }
 0x4b4   : > { %v964_v40 = vmul.f32 %v963_v39, %v956_v33 }
 0x4b6   : > { %v1286_v41 = vmul.f32 -1.442695, %v964_v40 }
 0x4b8   : > { %1599 = vpow2.f32 %v1286_v41 }
 0x4c2   : > { %v1600_v42 = vpop.eup %1599 }
 0x4c3   : > { %v968_v43 = vadd.f32 1.0, %v1600_v42 }
 0x4c5   : > { %1601 = vrcp.f32 %v968_v43 }
 0x4cf   : > { %v1602_v0 = vpop.eup %1601 }
 0x4d0   : > { %v971_v44 = vmul.f32 %v1602_v0, %v956_v33 }
 0x4d2   : > { %v972_v45 = vadd.f32 %v971_v44, %v848_v21 }
 0x4d4   : > { %v973_v46 = vpack.c.bf16 %v972_v45, %v972_v45 }
 0x4d6   : > { %1443 = vmatmul.mubr.bf16.vlgmr.msra.gmra.mrb[8].mxu0 %v973_v46 }
 0x5a9   : > { %v1079_v48 = vpop.f32.mrb[8].mxu0 }
 0x5aa   : > { %v1080_v49 = vadd.f32 %v1287_v47, %v1079_v48  ;;  %v1444_v50 = vpop.f32.mrb[9].mxu0 }
 0x5ab   : > { %v1082_v51 = vpop.f32.mrb[10].mxu0 }
 0x5ac   : > { %v1085_v52 = vmul.f32 %v1080_v49, %v1080_v49  ;;  %v1445_v53 = vpop.f32.mrb[11].mxu0 }
 0x5ae   : > { %v1086_v54 = vmul.f32 0.071354814, %v1085_v52 }
 0x5b0   : > { %v1087_v55 = vadd.f32 1.5957692, %v1086_v54 }
 0x5b2   : > { %v1088_v56 = vmul.f32 %v1087_v55, %v1080_v49 }
 0x5b4   : > { %v1296_v57 = vmul.f32 -1.442695, %v1088_v56 }
 0x5b6   : > { %1603 = vpow2.f32 %v1296_v57 }
 0x5c0   : > { %v1604_v58 = vpop.eup %1603 }
 0x5c1   : > { %v1092_v59 = vadd.f32 1.0, %v1604_v58 }
 0x5c3   : > { %1605 = vrcp.f32 %v1092_v59 }
 0x5cd   : > { %v1606_v60 = vpop.eup %1605 }
 0x5ce   : > { %v1095_v61 = vmul.f32 %v1606_v60, %v1080_v49 }
 0x5d0   : > { %1096 = vst [vmem:[%s474_s13] sm:$0xff] %v1095_v61 }
 0x5d1   : > { %1790 = shalt.err (!%p1787_p3)
}
 0x5d2   : > { %s1791_s1 = scalar_lea.hbm %s2267_s12, 128  ;;  %s1795_s24 = scalar_lea.hbm %s2349_s27, 256 }
 0x5d3   : > { %p1792_p6 = scmp.ne.s32.totalorder %s2267_s12, %s1791_s1  ;;  %p1796_p8 = scmp.lt.u32.totalorder %s2267_s12, %s2349_s27 }
 0x5d4   : > { %p1797_p5 = scmp.lt.u32.totalorder %s1795_s24, %s1791_s1  ;;  %p1799_p7 = scmp.lt.u32.totalorder %s1791_s1, %s2267_s12 }
 0x5d5   : > { %p1793_p10 = pnand %p1792_p6, %p2350_p4 }
 0x5d6   : > { %p1798_p9 = por %p1797_p5, %p1796_p8 }
 0x5d7   : > { %p1794_p11 = pneg %p1793_p10 }
 0x5d8   : > { %p1800_p12 = por %p1799_p7, %p1798_p9 }
 0x5da   : > { %p1801_p1 = pnand %p1800_p12, %p1794_p11 }
 0x5dc   : > { %1804 = shalt.err (!%p1801_p1)
}
 0x5dd   : > { %1468 = dma.vmem_to_hbm [thread:$0]  (%p2350_p4), %s2269_s26, 128, %s2267_s12, %s1098_s22  }
 0x5de PF: > { %s1123_s29 = sand.u32 1, %s1843_s17   ;;  %p2351_p13 = scmp.ne.s32.totalorder %s2338_s14, 0 }
 0x5df   : > { %p2352_p0 = scmp.ge.s32.totalorder %s1855_s20, 2  ;;  %s1124_s8 = scalar_lea.sflag [#allocation4], %s1123_s29 }
 0x5e1   : > { %p1491_p2 = pnand %p2352_p0, %p2351_p13 }
 0x5e3   : > { %1838 = dma.done.wait (!%p1491_p2), %s1124_s8, 128  }
 0x5e4   : > { %1840 = vsyncadd (!%p1491_p2), %s1124_s8, 4294967168  ;;  %p27_p3 = scmp.ge.s32.totalorder %s2101_s16, 4   ;;  %s2353_s17 = smov %s1847_s18 }
 0x5e5   : > { %s2354_s18 = smov %s1851_s19  ;;  %s2355_s19 = smov %s2113_s10 }
 0x5e6   : > { %s2356_s20 = smov %s2101_s16  ;;  %29 = sbr.rel (!%p27_p3) target bundleno = 13 (0xd), region = 129 }
 0x5ed   :  { %1129 = vsyncpa [#allocation3], 1 }
 0x5ee   :  { %1131 = vsyncpa [#allocation3 + $0x1], 1 }
 0x5ef   :  { %1132 = vsyncpa [#allocation6], 1 }
 0x5f0   :  { %1133 = vsyncpa [#allocation9], 1 }
 0x5f1   :  { %1134 = vsyncpa [#allocation12], 1 }
 0x5f2   :  { %1135 = vsyncpa [#allocation4], 1 }
 0x5f3   :  { %1137 = vsyncpa [#allocation4 + $0x1], 1 }

// kernel: tpu_custom_call.1
= control target key start
LH: loop header
LB: loop body
LE: loop exit
PB: predicated region body
PF: predicated region fallthrough
CT: control target
= control target key end

     0   :  { %s2311_s0 = inlined_call_operand.hbm [shape: f32[16,128], index: 0, kind: input, shape index: {}]   ;;  %s2312_s1 = inlined_call_operand.hbm [shape: bf16[128,128], index: 1, kind: input, shape index: {}]   ;;  %s2313_s2 = inlined_call_operand.vmem [shape: f32[1,128], index: 2, kind: input, shape index: {}]   ;;  %s2314_s3 = inlined_call_operand.hbm [shape: bf16[128,128], index: 3, kind: input, shape index: {}]   ;;  %s2315_s4 = inlined_call_operand.vmem [shape: f32[1,128], index: 4, kind: input, shape index: {}]   ;;  %s2316_s5 = inlined_call_operand.hbm [shape: bf16[128,128], index: 5, kind: input, shape index: {}]   ;;  %s2317_s6 = inlined_call_operand.vmem [shape: f32[1,128], index: 6, kind: input, shape index: {}]   ;;  %s2318_s7 = inlined_call_operand.hbm [shape: bf16[128,128], index: 7, kind: input, shape index: {}]   ;;  %s2319_s8 = inlined_call_operand.vmem [shape: f32[1,128], index: 8, kind: input, shape index: {}]   ;;  %s2320_s9 = inlined_call_operand.hbm [shape: bf16[128,128], index: 9, kind: input, shape index: {}]   ;;  %s2321_s10 = inlined_call_operand.vmem [shape: f32[1,128], index: 10, kind: input, shape index: {}]   ;;  %s2322_s11 = inlined_call_operand.hbm [shape: f32[16,128], index: 11, kind: output, shape index: {}]  }
   0x1   :  { %2327 = sst [smem:[#allocation19_spill]] %s2312_s1 }
   0x2   :  { %2328 = sst [smem:[#allocation20_spill]] %s2319_s8 }
   0x3   :  { %2329 = sst [smem:[#allocation21_spill]] %s2321_s10 }
   0x4   :  { %2330 = sst [smem:[#allocation22_spill]] %s2322_s11 }
   0x5   :  { %16 = vsyncpa [#allocation3], 0 }
   0x6   :  { %18 = vsyncpa [#allocation3 + $0x1], 0 }
   0x7   :  { %19 = vsyncpa [#allocation6], 0 }
   0x8   :  { %20 = vsyncpa [#allocation9], 0 }
   0x9   :  { %21 = vsyncpa [#allocation12], 0 }
   0xa   :  { %22 = vsyncpa [#allocation4], 0 }
   0xb   :  { %24 = vsyncpa [#allocation4 + $0x1], 0  ;;  %s1928_s17 = smov 0   ;;  %s1930_s18 = smov 0  }
   0xc   :  { %s1932_s19 = smov 0   ;;  %s1934_s20 = smov 0  }
   0xd LB: > { %s1857_s21 = smov [#allocation5]   ;;  %s1949_s23 = sadd.s32 4294967295, %s1855_s20   ;;  %s1855_s20 = sphi %s1934_s20, %s2356_s20   ;;  %s1851_s19 = sphi %s1932_s19, %s2355_s19   ;;  %s1847_s18 = sphi %s1930_s18, %s2354_s18   ;;  %s1843_s17 = sphi %s1928_s17, %s2353_s17  }
   0xe   : > { %s309_s22 = sshll.u32 %s1857_s21, 4  ;;  %p1230_p0 = scmp.ge.s32.totalorder %s1855_s20, 1  ;;  %s1954_s22 = int_to_ptr.vmem [resolvable:$true] %s309_s22 }
   0xf   : > { %p2324_p1 = scmp.eq.s32.totalorder %s1949_s23, 0  ;;  %p297_p2 = scmp.lt.s32.totalorder %s1855_s20, 3 }
  0x10   : > { %s1858_s25 = smov [#allocation8]   ;;  %s1859_s28 = smov [#allocation7]  }
  0x11   : > { %p1956_p3 = pnand %p1230_p0, %p297_p2  ;;  %s341_s26 = sshll.u32 %s1858_s25, 4  ;;  %s1969_s26 = int_to_ptr.vmem [resolvable:$true] %s341_s26 }
  0x12   : > { %s325_s29 = sshll.u32 %s1859_s28, 4  ;;  %s2333_s1 = sld [smem:[#allocation19_spill]]  ;;  %s1971_s29 = int_to_ptr.vmem [resolvable:$true] %s325_s29 }
  0x13   : > { %s2331_s24 = scalar_select %p1956_p3, 1, 0 }
  0x14   : > { %p1470_p5 = pneg %p1956_p3 }
  0x16   : > { %p1965_p6 = pnand %p1470_p5, %p2324_p1 }
  0x18   : > { %s1607_s13 = scalar_lea.hbm %s2333_s1, 1024  ;;  %p1981_p8 = pneg %p1965_p6 }
  0x19   : > { %p1608_p7 = scmp.ne.s32.totalorder %s2333_s1, %s1607_s13  ;;  %p1614_p11 = scmp.lt.u32.totalorder %s1607_s13, %s2333_s1 }
  0x1b   : > { %p1610_p9 = pnand %p1981_p8, %p1608_p7 }
  0x1d   : > { %p1611_p10 = pneg %p1610_p9 }
  0x1f   : > { %p1616_p12 = pnand %p1614_p11, %p1611_p10 }
  0x21   : > { %1619 = shalt.err (!%p1616_p12)
}
  0x22   : > { %s1620_s28 = scalar_lea.vmem %s1954_s22, 1024  ;;  %p1628_p5 = scmp.lt.s32.totalorder %s1954_s22, %s1954_s22 }
  0x23   : > { %p1621_p13 = scmp.ne.s32.totalorder %s1954_s22, %s1620_s28  ;;  %p1629_p4 = scmp.lt.s32.totalorder %s1620_s28, %s1620_s28 }
  0x25   : > { %p1623_p0 = pnand %p1621_p13, %p1981_p8  ;;  %p1630_p7 = por %p1629_p4, %p1628_p5 }
  0x27   : > { %p1624_p2 = pneg %p1623_p0 }
  0x29   : > { %p1631_p9 = pnand %p1630_p7, %p1624_p2 }
  0x2b   : > { %1634 = shalt.err (!%p1631_p9)
}
  0x2c   : > { %s1860_s30 = smov 64   ;;  %s1861_s12 = smov 4  }
  0x2d   : > { %1473 = dma.hbm_to_vmem [thread:$0]  (!%p1965_p6), %s2333_s1, 1024, %s1954_s22, [#allocation6], %s1860_s30, %s1860_s30, %s1861_s12  }
  0x2e   : > { %s1635_s25 = scalar_lea.hbm %s2316_s5, 1024 }
  0x2f   : > { %p1636_p4 = scmp.ne.s32.totalorder %s2316_s5, %s1635_s25  ;;  %p1642_p12 = scmp.lt.u32.totalorder %s1635_s25, %s2316_s5 }
  0x31   : > { %p1638_p10 = pnand %p1636_p4, %p1981_p8 }
  0x33   : > { %p1639_p11 = pneg %p1638_p10 }
  0x35   : > { %p1644_p13 = pnand %p1642_p12, %p1639_p11 }
  0x37   : > { %1647 = shalt.err (!%p1644_p13)
}
  0x38   : > { %s1648_s22 = scalar_lea.vmem %s1969_s26, 1024  ;;  %p1656_p7 = scmp.lt.s32.totalorder %s1969_s26, %s1969_s26 }
  0x39   : > { %p1649_p0 = scmp.ne.s32.totalorder %s1969_s26, %s1648_s22  ;;  %p1657_p9 = scmp.lt.s32.totalorder %s1648_s22, %s1648_s22 }
  0x3b   : > { %p1651_p2 = pnand %p1649_p0, %p1981_p8  ;;  %p1658_p4 = por %p1657_p9, %p1656_p7 }
  0x3d   : > { %p1652_p5 = pneg %p1651_p2 }
  0x3f   : > { %p1659_p10 = pnand %p1658_p4, %p1652_p5 }
  0x41   : > { %1662 = shalt.err (!%p1659_p10)
}
  0x42   : > { %1479 = dma.hbm_to_vmem [thread:$0]  (!%p1965_p6), %s2316_s5, 1024, %s1969_s26, [#allocation9], %s1860_s30, %s1860_s30, %s1861_s12  }
  0x43   : > { %s1663_s14 = scalar_lea.hbm %s2314_s3, 1024 }
  0x44   : > { %p1664_p11 = scmp.ne.s32.totalorder %s2314_s3, %s1663_s14  ;;  %p1670_p0 = scmp.lt.u32.totalorder %s1663_s14, %s2314_s3 }
  0x46   : > { %p1666_p12 = pnand %p1664_p11, %p1981_p8 }
  0x48   : > { %p1667_p13 = pneg %p1666_p12 }
  0x4a   : > { %p1672_p2 = pnand %p1670_p0, %p1667_p13 }
  0x4c   : > { %1675 = shalt.err (!%p1672_p2)
}
  0x4d   : > { %s1676_s26 = scalar_lea.vmem %s1971_s29, 1024  ;;  %p1684_p4 = scmp.lt.s32.totalorder %s1971_s29, %s1971_s29 }
  0x4e   : > { %p1677_p5 = scmp.ne.s32.totalorder %s1971_s29, %s1676_s26  ;;  %p1685_p10 = scmp.lt.s32.totalorder %s1676_s26, %s1676_s26 }
  0x50   : > { %p1679_p7 = pnand %p1677_p5, %p1981_p8  ;;  %p1686_p11 = por %p1685_p10, %p1684_p4 }
  0x52   : > { %p1680_p9 = pneg %p1679_p7 }
  0x54   : > { %p1687_p12 = pnand %p1686_p11, %p1680_p9 }
  0x56   : > { %1690 = shalt.err (!%p1687_p12)
}
  0x57   : > { %1476 = dma.hbm_to_vmem [thread:$0]  (!%p1965_p6), %s2314_s3, 1024, %s1971_s29, [#allocation6], %s1860_s30, %s1860_s30, %s1861_s12  }
  0x58   : > { %s1862_s10 = smov [#allocation10]   ;;  %s1863_s13 = smov [#allocation11]  }
  0x59   : > { %s357_s11 = sshll.u32 %s1862_s10, 4  ;;  %s373_s14 = sshll.u32 %s1863_s13, 4  ;;  %s358_s11 = int_to_ptr.vmem [resolvable:$true] %s357_s11  ;;  %s374_s14 = int_to_ptr.vmem [resolvable:$true] %s373_s14 }
  0x5a   : > { %s1691_s25 = scalar_lea.hbm %s2318_s7, 1024 }
  0x5b   : > { %p1692_p13 = scmp.ne.s32.totalorder %s2318_s7, %s1691_s25  ;;  %p1698_p5 = scmp.lt.u32.totalorder %s1691_s25, %s2318_s7 }
  0x5d   : > { %p1694_p0 = pnand %p1692_p13, %p1981_p8 }
  0x5f   : > { %p1695_p2 = pneg %p1694_p0 }
  0x61   : > { %p1700_p7 = pnand %p1698_p5, %p1695_p2 }
  0x63   : > { %1703 = shalt.err (!%p1700_p7)
}
  0x64   : > { %s1704_s29 = scalar_lea.vmem %s358_s11, 1024  ;;  %p1712_p11 = scmp.lt.s32.totalorder %s358_s11, %s358_s11 }
  0x65   : > { %p1705_p9 = scmp.ne.s32.totalorder %s358_s11, %s1704_s29  ;;  %p1713_p12 = scmp.lt.s32.totalorder %s1704_s29, %s1704_s29 }
  0x67   : > { %p1707_p4 = pnand %p1705_p9, %p1981_p8  ;;  %p1714_p1 = por %p1713_p12, %p1712_p11 }
  0x69   : > { %p1708_p10 = pneg %p1707_p4 }
  0x6b   : > { %p1715_p3 = pnand %p1714_p1, %p1708_p10 }
  0x6d   : > { %1718 = shalt.err (!%p1715_p3)
}
  0x6e   : > { %1482 = dma.hbm_to_vmem [thread:$0]  (!%p1965_p6), %s2318_s7, 1024, %s358_s11, [#allocation9], %s1860_s30, %s1860_s30, %s1861_s12  }
  0x6f   : > { %s1719_s15 = scalar_lea.hbm %s2320_s9, 1024 }
  0x70   : > { %p1720_p1 = scmp.ne.s32.totalorder %s2320_s9, %s1719_s15  ;;  %p1726_p0 = scmp.lt.u32.totalorder %s1719_s15, %s2320_s9 }
  0x72   : > { %p1722_p3 = pnand %p1720_p1, %p1981_p8 }
  0x74   : > { %p1723_p13 = pneg %p1722_p3 }
  0x76   : > { %p1728_p2 = pnand %p1726_p0, %p1723_p13 }
  0x78   : > { %1731 = shalt.err (!%p1728_p2)
}
  0x79   : > { %s1732_s22 = scalar_lea.vmem %s374_s14, 1024  ;;  %p1740_p4 = scmp.lt.s32.totalorder %s374_s14, %s374_s14 }
  0x7a   : > { %p1733_p5 = scmp.ne.s32.totalorder %s374_s14, %s1732_s22  ;;  %p1741_p10 = scmp.lt.s32.totalorder %s1732_s22, %s1732_s22 }
  0x7c   : > { %p1735_p7 = pnand %p1733_p5, %p1981_p8  ;;  %p1742_p11 = por %p1741_p10, %p1740_p4 }
  0x7e   : > { %p1736_p9 = pneg %p1735_p7 }
  0x80   : > { %p1743_p12 = pnand %p1742_p11, %p1736_p9 }
  0x82   : > { %1746 = shalt.err (!%p1743_p12)
}
  0x83   : > { %1485 = dma.hbm_to_vmem [thread:$0]  (!%p1965_p6), %s2320_s9, 1024, %s374_s14, [#allocation12], %s1860_s30, %s1860_s30, %s1861_s12  }
  0x84   : > { %s1229_s27 = sadd.s32 4294967294, %s1855_s20   ;;  %s2101_s16 = sadd.s32 1, %s1855_s20  }
  0x85   : > { %s37_s1 = sadd.s32 1, %s1851_s19  ;;  %s34_s8 = ssub.s32 %s1855_s20, %s2101_s16 }
  0x86   : > { %p44_p8 = scmp.ne.s32.totalorder %s1851_s19, %s1847_s18  ;;  %p35_p1 = scmp.eq.s32.totalorder %s34_s8, 0 }
  0x87   : > { %p45_p3 = scmp.eq.s32.totalorder %s1855_s20, 0  ;;  %p50_p13 = scmp.ne.s32.totalorder %s1847_s18, %s1843_s17 }
  0x88   : > { %p284_p0 = scmp.eq.s32.totalorder %s1949_s23, 1  ;;  %p2335_p5 = scmp.eq.s32.totalorder %s1949_s23, 0 }
  0x89   : > { %s2113_s10 = scalar_select %p35_p1, %s1851_s19, %s37_s1  }
  0x8a   : > { %p46_p2 = por %p45_p3, %p44_p8  ;;  %p2117_p7 = por %p2335_p5, %p50_p13 }
  0x8b   : > { %p2121_p6 = por %p284_p0, %p44_p8  ;;  %p290_p9 = scmp.eq.s32.totalorder %s1229_s27, 1 }
  0x8c   : > { %p1499_p4 = scmp.lt.s32.totalorder %s1855_s20, 2  ;;  %s390_s12 = sand.u32 1, %s1851_s19  }
  0x8d   : > { %s2337_s30 = scalar_select %p2121_p6, 1, 0 }
  0x8e   : > { %p2127_p10 = por %p290_p9, %p50_p13  ;;  %s1237_s15 = sshll.u32 %s390_s12, 3 }
  0x8f   : > { %s1238_s21 = sshll.u32 %s1855_s20, 7  ;;  %s394_s22 = scalar_lea.vmem [#allocation2], %s1237_s15 }
  0x90   : > { %s2338_s14 = scalar_select %p2127_p10, 1, 0 }
  0x91   : > { %s2135_s26 = scalar_lea.hbm %s2311_s0, %s1238_s21  ;;  %s401_s11 = sshll.u32 %s394_s22, 4  ;;  %s2141_s11 = int_to_ptr.vmem [resolvable:$true] %s401_s11 }
  0x92   : > { %p2137_p11 = pnand %p1499_p4, %p46_p2  ;;  %s391_s27 = scalar_lea.sflag [#allocation3], %s390_s12 }
  0x93   : > { %s1747_s1 = scalar_lea.hbm %s2135_s26, 128  ;;  %s1752_s21 = scalar_lea.hbm %s2311_s0, 256 }
  0x94   : > { %p1748_p12 = scmp.ne.s32.totalorder %s2135_s26, %s1747_s1  ;;  %p1749_p8 = pneg %p2137_p11 }
  0x95   : > { %p1753_p13 = scmp.lt.u32.totalorder %s2135_s26, %s2311_s0  ;;  %p1754_p0 = scmp.lt.u32.totalorder %s1752_s21, %s1747_s1 }
  0x96   : > { %p1750_p1 = pnand %p1749_p8, %p1748_p12  ;;  %p1756_p5 = scmp.lt.u32.totalorder %s1747_s1, %s2135_s26 }
  0x97   : > { %p1755_p2 = por %p1754_p0, %p1753_p13 }
  0x98   : > { %p1751_p3 = pneg %p1750_p1 }
  0x99   : > { %p1757_p9 = por %p1756_p5, %p1755_p2 }
  0x9b   : > { %p1758_p4 = pnand %p1757_p9, %p1751_p3 }
  0x9d   : > { %1761 = shalt.err (!%p1758_p4)
}
  0x9e   : > { %s1762_s12 = scalar_lea.vmem %s2141_s11, 128  ;;  %s1864_s22 = smov [#allocation2]  }
  0x9f   : > { %p1763_p12 = scmp.ne.s32.totalorder %s2141_s11, %s1762_s12  ;;  %s1767_s8 = sshll.u32 %s1864_s22, 4  ;;  %s1768_s8 = int_to_ptr.vmem [resolvable:$false] %s1767_s8 }
  0xa0   : > { %s1769_s15 = scalar_lea.vmem %s1768_s8, 256  ;;  %p1770_p6 = scmp.lt.s32.totalorder %s2141_s11, %s1768_s8 }
  0xa1   : > { %p1765_p1 = pnand %p1763_p12, %p1749_p8  ;;  %p1771_p13 = scmp.lt.s32.totalorder %s1769_s15, %s1762_s12 }
  0xa3   : > { %p1766_p10 = pneg %p1765_p1  ;;  %p1772_p0 = por %p1771_p13, %p1770_p6 }
  0xa5   : > { %p1773_p2 = pnand %p1772_p0, %p1766_p10 }
  0xa7   : > { %1776 = shalt.err (!%p1773_p2)
}
  0xa8   : > { %1489 = dma.hbm_to_vmem [thread:$0]  (!%p2137_p11), %s2135_s26, 128, %s2141_s11, %s391_s27  }
  0xa9   : > { %p2340_p3 = scmp.ne.s32.totalorder %s2331_s24, 0 }
  0xaa   : > { %s2171_s1 = sand.u32 (!%p2340_p3), 1, %s1847_s18  }
  0xab   : > { %410 = sbr.rel (%p2340_p3) target bundleno = 1502 (0x5de), region = 64  ;;  %s1240_s21 = sshll.u32 (!%p2340_p3), %s2171_s1, 3 }
  0xac   : > { %s413_s25 = scalar_lea.sflag (!%p2340_p3), [#allocation3], %s2171_s1  ;;  %s2177_s28 = scalar_lea.vmem (!%p2340_p3), [#allocation2], %s1240_s21 }
  0xb2   : > { %1822 = dma.done.wait (%p2117_p7), %s413_s25, 128  }
  0xb3   : > { %1824 = vsyncadd (%p2117_p7), %s413_s25, 4294967168  ;;  %p2341_p6 = scmp.eq.s32.totalorder %s1949_s23, 0 }
  0xb5   : > { %1826 = dma.done.wait (%p2341_p6), [#allocation6], 2048   ;;  %p2342_p10 = pmov %p2341_p6 }
  0xb6   : > { %p2343_p11 = pmov %p2341_p6 }
  0xb7   : > { %1828 = vsyncadd (%p2342_p10), [#allocation6], 4294965248 }
  0xb8   : > { %1830 = dma.done.wait (%p2343_p11), [#allocation9], 2048   ;;  %p2344_p8 = pmov %p2341_p6 }
  0xb9   : > { %p2345_p5 = pmov %p2341_p6 }
  0xba   : > { %1832 = vsyncadd (%p2344_p8), [#allocation9], 4294965248 }
  0xbb   : > { %1834 = dma.done.wait (%p2345_p5), [#allocation12], 1024   ;;  %p2346_p9 = pmov %p2345_p5 }
  0xbc   : > { %v1865_v0 = vmov 0.0   ;;  %vm1866_vm0 = vmmov 0   ;;  %v1547_v1 = vld [vmem:[#allocation5] sm:$0xff]   ;;  %v1548_v2 = vld [vmem:[#allocation5 + $0x8] sm:$0xff]   ;;  %v1549_v3 = vld [vmem:[#allocation5 + $0x10] sm:$0xff]   ;;  %s2347_s8 = sld [smem:[#allocation20_spill]] }
  0xbd   : > { %1836 = vsyncadd (%p2346_p9), [#allocation12], 4294966272  ;;  %1346 = vmatprep.subr.bf16.mxu0 %v1865_v0  ;;  %1362 = vmatprep.mubr.msk.bf16.mxu0 %vm1866_vm0, %v1865_v0  ;;  %v1550_v4 = vld [vmem:[#allocation5 + $0x18] sm:$0xff]   ;;  %v1551_v5 = vld [vmem:[#allocation5 + $0x20] sm:$0xff]   ;;  %s1298_s24 = sshll.u32 %s1949_s23, 7  ;;  %s474_s13 = scalar_lea.vmem [#allocation13], %s1240_s21 }
  0xbe   : > { %1366 = vmatprep.subr.bf16.mxu1 %v1865_v0  ;;  %1382 = vmatprep.mubr.msk.bf16.mxu1 %vm1866_vm0, %v1865_v0  ;;  %v1552_v6 = vld [vmem:[#allocation5 + $0x28] sm:$0xff]   ;;  %v1553_v7 = vld [vmem:[#allocation5 + $0x30] sm:$0xff]   ;;  %v1554_v8 = vld [vmem:[#allocation5 + $0x38] sm:$0xff]   ;;  %s1111_s26 = sshll.u32 %s474_s13, 4  ;;  %s2349_s27 = sld [smem:[#allocation22_spill]]  ;;  %s2269_s26 = int_to_ptr.vmem [resolvable:$true] %s1111_s26 }
  0xbf   : > { %1347 = vmatpush3.bf16.msra.mxu0 %v1547_v1  ;;  %v476_v9 = vld [vmem:[%s2177_s28] sm:$0xff]  ;;  %v1555_v11 = vld [vmem:[#allocation7] sm:$0xff]   ;;  %v1556_v12 = vld [vmem:[#allocation7 + $0x8] sm:$0xff]   ;;  %s2348_s28 = sld [smem:[#allocation21_spill]]  ;;  %s1098_s22 = scalar_lea.sflag [#allocation4], %s2171_s1 }
  0xc0   : > { %1348 = vmatprep.subr.bf16.mxu0 %v1865_v0  ;;  %v477_v10 = vpack.c.bf16 %v476_v9, %v476_v9  ;;  %1367 = vmatpush3.bf16.msra.mxu1 %v1555_v11  ;;  %v1557_v13 = vld [vmem:[#allocation7 + $0x10] sm:$0xff]   ;;  %v1558_v14 = vld [vmem:[#allocation7 + $0x18] sm:$0xff]   ;;  %v1559_v15 = vld [vmem:[#allocation7 + $0x20] sm:$0xff]   ;;  %p2350_p4 = scmp.ne.s32.totalorder %s2337_s30, 0  ;;  %s1867_s23 = smov [#allocation13]  }
  0xc1   : > { %1368 = vmatprep.subr.bf16.mxu1 %v1865_v0  ;;  %v1560_v16 = vld [vmem:[#allocation7 + $0x28] sm:$0xff]   ;;  %v1561_v17 = vld [vmem:[#allocation7 + $0x30] sm:$0xff]   ;;  %v1562_v18 = vld [vmem:[#allocation7 + $0x38] sm:$0xff]   ;;  %s1781_s21 = sshll.u32 %s1867_s23, 4  ;;  %s1782_s21 = int_to_ptr.vmem [resolvable:$false] %s1781_s21 }
  0xc2   : > { %v1247_v19 = vld [vmem:[%s2313_s2] ss:$0 sm:$0xff]  ;;  %v1563_v36 = vld [vmem:[#allocation8] sm:$0xff]   ;;  %v1564_v37 = vld [vmem:[#allocation8 + $0x8] sm:$0xff]   ;;  %s1783_s15 = scalar_lea.vmem %s1782_s21, 256  ;;  %p1784_p13 = scmp.lt.s32.totalorder %s2269_s26, %s1782_s21 }
  0xc3   : > { %1349 = vmatpush3.bf16.msra.mxu0 %v1548_v2  ;;  %v1565_v38 = vld [vmem:[#allocation8 + $0x10] sm:$0xff]   ;;  %v1566_v39 = vld [vmem:[#allocation8 + $0x18] sm:$0xff]   ;;  %v1567_v40 = vld [vmem:[#allocation8 + $0x20] sm:$0xff]  }
  0xc4   : > { %1350 = vmatprep.subr.bf16.mxu0 %v1865_v0  ;;  %1369 = vmatpush3.bf16.msra.mxu1 %v1556_v12  ;;  %v1568_v41 = vld [vmem:[#allocation8 + $0x28] sm:$0xff]   ;;  %v1569_v42 = vld [vmem:[#allocation8 + $0x30] sm:$0xff]   ;;  %v1570_v43 = vld [vmem:[#allocation8 + $0x38] sm:$0xff]   ;;  %s2267_s12 = scalar_lea.hbm %s2349_s27, %s1298_s24 }
  0xc5   : > { %1370 = vmatprep.subr.bf16.mxu1 %v1865_v0  ;;  %v1257_v44 = vld [vmem:[%s2315_s4] ss:$0 sm:$0xff]  ;;  %v1571_v61 = vld [vmem:[#allocation10] sm:$0xff]   ;;  %v1572_v62 = vld [vmem:[#allocation10 + $0x8] sm:$0xff]  }
  0xc6   : > { %v1573_v63 = vld [vmem:[#allocation10 + $0x10] sm:$0xff]   ;;  %v1574_v1 = vld [vmem:[#allocation10 + $0x18] sm:$0xff]   ;;  %v1575_v2 = vld [vmem:[#allocation10 + $0x20] sm:$0xff]  }
  0xc7   : > { %1351 = vmatpush3.bf16.msra.mxu0 %v1549_v3  ;;  %v1576_v3 = vld [vmem:[#allocation10 + $0x28] sm:$0xff]  }
  0xc8   : > { %1352 = vmatprep.subr.bf16.mxu0 %v1865_v0  ;;  %1371 = vmatpush3.bf16.msra.mxu1 %v1557_v13 }
  0xc9   : > { %1372 = vmatprep.subr.bf16.mxu1 %v1865_v0 }
  0xcb   : > { %1353 = vmatpush3.bf16.msra.mxu0 %v1550_v4  ;;  %v1577_v4 = vld [vmem:[#allocation10 + $0x30] sm:$0xff]  }
  0xcc   : > { %1354 = vmatprep.subr.bf16.mxu0 %v1865_v0  ;;  %1373 = vmatpush3.bf16.msra.mxu1 %v1558_v14 }
  0xcd   : > { %1374 = vmatprep.subr.bf16.mxu1 %v1865_v0 }
  0xcf   : > { %1355 = vmatpush3.bf16.msra.mxu0 %v1551_v5  ;;  %v1578_v5 = vld [vmem:[#allocation10 + $0x38] sm:$0xff]  }
  0xd0   : > { %1356 = vmatprep.subr.bf16.mxu0 %v1865_v0  ;;  %1375 = vmatpush3.bf16.msra.mxu1 %v1559_v15 }
  0xd1   : > { %1376 = vmatprep.subr.bf16.mxu1 %v1865_v0 }
  0xd3   : > { %1357 = vmatpush3.bf16.msra.mxu0 %v1552_v6  ;;  %v1267_v6 = vld [vmem:[%s2317_s6] ss:$0 sm:$0xff] }
  0xd4   : > { %1358 = vmatprep.subr.bf16.mxu0 %v1865_v0  ;;  %1377 = vmatpush3.bf16.msra.mxu1 %v1560_v16 }
  0xd5   : > { %1378 = vmatprep.subr.bf16.mxu1 %v1865_v0 }
  0xd7   : > { %1359 = vmatpush3.bf16.msra.mxu0 %v1553_v7 }
  0xd8   : > { %1360 = vmatprep.subr.bf16.mxu0 %v1865_v0  ;;  %1379 = vmatpush3.bf16.msra.mxu1 %v1561_v17 }
  0xd9   : > { %1380 = vmatprep.subr.bf16.mxu1 %v1865_v0 }
  0xdb   : > { %1361 = vmatpush3.bf16.msra.mxu0 %v1554_v8 }
  0xdc   : > { %1386 = vmatprep.subr.bf16.mxu0 %v1865_v0  ;;  %1381 = vmatpush3.bf16.msra.mxu1 %v1562_v18 }
  0xdd   : > { %1406 = vmatprep.subr.bf16.mxu1 %v1865_v0 }
  0xde   : > { %1363 = vmatmul.mubr.bf16.vlgmr.msra.gmra.mrb[0].mxu0 %v477_v10 }
  0xdf   : > { %1402 = vmatprep.mubr.msk.bf16.mxu0 %vm1866_vm0, %v1865_v0  ;;  %1387 = vmatpush3.bf16.msra.mxu0 %v1563_v36 }
  0xe0   : > { %1388 = vmatprep.subr.bf16.mxu0 %v1865_v0 }
  0xe3   : > { %1389 = vmatpush3.bf16.msra.mxu0 %v1564_v37 }
  0xe4   : > { %1390 = vmatprep.subr.bf16.mxu0 %v1865_v0 }
  0xe7   : > { %1391 = vmatpush3.bf16.msra.mxu0 %v1565_v38 }
  0xe8   : > { %1392 = vmatprep.subr.bf16.mxu0 %v1865_v0 }
  0xeb   : > { %1393 = vmatpush3.bf16.msra.mxu0 %v1566_v39 }
  0xec   : > { %1394 = vmatprep.subr.bf16.mxu0 %v1865_v0 }
  0xef   : > { %1395 = vmatpush3.bf16.msra.mxu0 %v1567_v40 }
  0xf0   : > { %1396 = vmatprep.subr.bf16.mxu0 %v1865_v0 }
  0xf3   : > { %1397 = vmatpush3.bf16.msra.mxu0 %v1568_v41 }
  0xf4   : > { %1398 = vmatprep.subr.bf16.mxu0 %v1865_v0 }
  0xf7   : > { %1399 = vmatpush3.bf16.msra.mxu0 %v1569_v42 }
  0xf8   : > { %1400 = vmatprep.subr.bf16.mxu0 %v1865_v0 }
  0xfb   : > { %1401 = vmatpush3.bf16.msra.mxu0 %v1570_v43 }
  0xfc   : > { %1426 = vmatprep.subr.bf16.mxu0 %v1865_v0 }
 0x1b1   : > { %v583_v20 = vpop.f32.mrb[0].mxu0 }
 0x1b2   : > { %v584_v21 = vadd.f32 %v1247_v19, %v583_v20  ;;  %v1364_v22 = vpop.f32.mrb[1].mxu0 }
 0x1b3   : > { %v586_v23 = vpop.f32.mrb[2].mxu0 }
 0x1b4   : > { %v589_v24 = vmul.f32 %v584_v21, %v584_v21  ;;  %v1365_v25 = vpop.f32.mrb[3].mxu0  ;;  %v1579_v23 = vld [vmem:[#allocation11] sm:$0xff]  }
 0x1b5   : > { %v1581_v25 = vld [vmem:[#allocation11 + $0x10] sm:$0xff]  }
 0x1b6   : > { %v590_v26 = vmul.f32 0.071354814, %v589_v24  ;;  %v1580_v24 = vld [vmem:[#allocation11 + $0x8] sm:$0xff]  }
 0x1b8   : > { %v591_v27 = vadd.f32 1.5957692, %v590_v26  ;;  %v1582_v26 = vld [vmem:[#allocation11 + $0x18] sm:$0xff]  }
 0x1ba   : > { %v592_v28 = vmul.f32 %v591_v27, %v584_v21  ;;  %v1583_v27 = vld [vmem:[#allocation11 + $0x20] sm:$0xff]  }
 0x1bc   : > { %v1256_v29 = vmul.f32 -1.442695, %v592_v28  ;;  %v1584_v28 = vld [vmem:[#allocation11 + $0x28] sm:$0xff]  }
 0x1be   : > { %1587 = vpow2.f32 %v1256_v29  ;;  %v1585_v29 = vld [vmem:[#allocation11 + $0x30] sm:$0xff]  }
 0x1c8   : > { %v1588_v30 = vpop.eup %1587 }
 0x1c9   : > { %v596_v31 = vadd.f32 1.0, %v1588_v30  ;;  %v1586_v30 = vld [vmem:[#allocation11 + $0x38] sm:$0xff]  }
 0x1cb   : > { %1589 = vrcp.f32 %v596_v31  ;;  %v1277_v31 = vld [vmem:[%s2347_s8] ss:$0 sm:$0xff]  ;;  %s1777_s8 = scalar_lea.vmem %s2269_s26, 128 }
 0x1cc   : > { %p1778_p7 = scmp.ne.s32.totalorder %s2269_s26, %s1777_s8  ;;  %p1785_p0 = scmp.lt.s32.totalorder %s1783_s15, %s1777_s8 }
 0x1ce   : > { %p1779_p12 = pnand %p1778_p7, %p2350_p4  ;;  %p1786_p2 = por %p1785_p0, %p1784_p13 }
 0x1d0   : > { %p1780_p1 = pneg %p1779_p12 }
 0x1d2   : > { %p1787_p3 = pnand %p1786_p2, %p1780_p1 }
 0x1d5   : > { %v1590_v32 = vpop.eup %1589 }
 0x1d6   : > { %v599_v33 = vmul.f32 %v1590_v32, %v584_v21 }
 0x1d8   : > { %v600_v34 = vadd.f32 %v599_v33, %v476_v9 }
 0x1da   : > { %v601_v35 = vpack.c.bf16 %v600_v34, %v600_v34 }
 0x1dc   : > { %1383 = vmatmul.mubr.bf16.vlgmr.msra.gmra.mrb[0].mxu1 %v601_v35 }
 0x1dd   : > { %1422 = vmatprep.mubr.msk.bf16.mxu1 %vm1866_vm0, %v1865_v0  ;;  %1407 = vmatpush3.bf16.msra.mxu1 %v1571_v61 }
 0x1de   : > { %1408 = vmatprep.subr.bf16.mxu1 %v1865_v0 }
 0x1e1   : > { %1409 = vmatpush3.bf16.msra.mxu1 %v1572_v62 }
 0x1e2   : > { %1410 = vmatprep.subr.bf16.mxu1 %v1865_v0 }
 0x1e5   : > { %1411 = vmatpush3.bf16.msra.mxu1 %v1573_v63 }
 0x1e6   : > { %1412 = vmatprep.subr.bf16.mxu1 %v1865_v0 }
 0x1e9   : > { %1413 = vmatpush3.bf16.msra.mxu1 %v1574_v1 }
 0x1ea   : > { %1414 = vmatprep.subr.bf16.mxu1 %v1865_v0 }
 0x1ed   : > { %1415 = vmatpush3.bf16.msra.mxu1 %v1575_v2 }
 0x1ee   : > { %1416 = vmatprep.subr.bf16.mxu1 %v1865_v0 }
 0x1f1   : > { %1417 = vmatpush3.bf16.msra.mxu1 %v1576_v3 }
 0x1f2   : > { %1418 = vmatprep.subr.bf16.mxu1 %v1865_v0 }
 0x1f5   : > { %1419 = vmatpush3.bf16.msra.mxu1 %v1577_v4 }
 0x1f6   : > { %1420 = vmatprep.subr.bf16.mxu1 %v1865_v0 }
 0x1f9   : > { %1421 = vmatpush3.bf16.msra.mxu1 %v1578_v5 }
 0x2af   : > { %v707_v45 = vpop.f32.mrb[0].mxu1 }
 0x2b0   : > { %v708_v46 = vadd.f32 %v1257_v44, %v707_v45  ;;  %v1384_v47 = vpop.f32.mrb[1].mxu1 }
 0x2b1   : > { %v710_v48 = vpop.f32.mrb[2].mxu1  ;;  %v1287_v47 = vld [vmem:[%s2348_s28] ss:$0 sm:$0xff] }
 0x2b2   : > { %v713_v49 = vmul.f32 %v708_v46, %v708_v46  ;;  %v1385_v50 = vpop.f32.mrb[3].mxu1 }
 0x2b4   : > { %v714_v51 = vmul.f32 0.071354814, %v713_v49 }
 0x2b6   : > { %v715_v52 = vadd.f32 1.5957692, %v714_v51 }
 0x2b8   : > { %v716_v53 = vmul.f32 %v715_v52, %v708_v46 }
 0x2ba   : > { %v1266_v54 = vmul.f32 -1.442695, %v716_v53 }
 0x2bc   : > { %1591 = vpow2.f32 %v1266_v54 }
 0x2c6   : > { %v1592_v55 = vpop.eup %1591 }
 0x2c7   : > { %v720_v56 = vadd.f32 1.0, %v1592_v55 }
 0x2c9   : > { %1593 = vrcp.f32 %v720_v56 }
 0x2d3   : > { %v1594_v57 = vpop.eup %1593 }
 0x2d4   : > { %v723_v58 = vmul.f32 %v1594_v57, %v708_v46 }
 0x2d6   : > { %v724_v59 = vadd.f32 %v723_v58, %v600_v34 }
 0x2d8   : > { %v725_v60 = vpack.c.bf16 %v724_v59, %v724_v59 }
 0x2da   : > { %1403 = vmatmul.mubr.bf16.vlgmr.msra.gmra.mrb[4].mxu0 %v725_v60 }
 0x2db   : > { %1442 = vmatprep.mubr.msk.bf16.mxu0 %vm1866_vm0, %v1865_v0  ;;  %1427 = vmatpush3.bf16.msra.mxu0 %v1579_v23 }
 0x2dc   : > { %1428 = vmatprep.subr.bf16.mxu0 %v1865_v0 }
 0x2df   : > { %1429 = vmatpush3.bf16.msra.mxu0 %v1580_v24 }
 0x2e0   : > { %1430 = vmatprep.subr.bf16.mxu0 %v1865_v0 }
 0x2e3   : > { %1431 = vmatpush3.bf16.msra.mxu0 %v1581_v25 }
 0x2e4   : > { %1432 = vmatprep.subr.bf16.mxu0 %v1865_v0 }
 0x2e7   : > { %1433 = vmatpush3.bf16.msra.mxu0 %v1582_v26 }
 0x2e8   : > { %1434 = vmatprep.subr.bf16.mxu0 %v1865_v0 }
 0x2eb   : > { %1435 = vmatpush3.bf16.msra.mxu0 %v1583_v27 }
 0x2ec   : > { %1436 = vmatprep.subr.bf16.mxu0 %v1865_v0 }
 0x2ef   : > { %1437 = vmatpush3.bf16.msra.mxu0 %v1584_v28 }
 0x2f0   : > { %1438 = vmatprep.subr.bf16.mxu0 %v1865_v0 }
 0x2f3   : > { %1439 = vmatpush3.bf16.msra.mxu0 %v1585_v29 }
 0x2f4   : > { %1440 = vmatprep.subr.bf16.mxu0 %v1865_v0 }
 0x2f7   : > { %1441 = vmatpush3.bf16.msra.mxu0 %v1586_v30 }
 0x3ad   : > { %v831_v7 = vpop.f32.mrb[4].mxu0 }
 0x3ae   : > { %v832_v8 = vadd.f32 %v1267_v6, %v831_v7  ;;  %v1404_v9 = vpop.f32.mrb[5].mxu0 }
 0x3af   : > { %v834_v10 = vpop.f32.mrb[6].mxu0 }
 0x3b0   : > { %v837_v11 = vmul.f32 %v832_v8, %v832_v8  ;;  %v1405_v12 = vpop.f32.mrb[7].mxu0 }
 0x3b2   : > { %v838_v13 = vmul.f32 0.071354814, %v837_v11 }
 0x3b4   : > { %v839_v14 = vadd.f32 1.5957692, %v838_v13 }
 0x3b6   : > { %v840_v15 = vmul.f32 %v839_v14, %v832_v8 }
 0x3b8   : > { %v1276_v16 = vmul.f32 -1.442695, %v840_v15 }
 0x3ba   : > { %1595 = vpow2.f32 %v1276_v16 }
 0x3c4   : > { %v1596_v17 = vpop.eup %1595 }
 0x3c5   : > { %v844_v18 = vadd.f32 1.0, %v1596_v17 }
 0x3c7   : > { %1597 = vrcp.f32 %v844_v18 }
 0x3d1   : > { %v1598_v19 = vpop.eup %1597 }
 0x3d2   : > { %v847_v20 = vmul.f32 %v1598_v19, %v832_v8 }
 0x3d4   : > { %v848_v21 = vadd.f32 %v847_v20, %v724_v59 }
 0x3d6   : > { %v849_v22 = vpack.c.bf16 %v848_v21, %v848_v21 }
 0x3d8   : > { %1423 = vmatmul.mubr.bf16.vlgmr.msra.gmra.mrb[4].mxu1 %v849_v22 }
 0x4ab   : > { %v955_v32 = vpop.f32.mrb[4].mxu1 }
 0x4ac   : > { %v956_v33 = vadd.f32 %v1277_v31, %v955_v32  ;;  %v1424_v34 = vpop.f32.mrb[5].mxu1 }
 0x4ad   : > { %v958_v35 = vpop.f32.mrb[6].mxu1 }
 0x4ae   : > { %v961_v36 = vmul.f32 %v956_v33, %v956_v33  ;;  %v1425_v37 = vpop.f32.mrb[7].mxu1 }
 0x4b0   : > { %v962_v38 = vmul.f32 0.071354814, %v961_v36 }
 0x4b2   : > { %v963_v39 = vadd.f32 1.5957692, %v962_v38 }
 0x4b4   : > { %v964_v40 = vmul.f32 %v963_v39, %v956_v33 }
 0x4b6   : > { %v1286_v41 = vmul.f32 -1.442695, %v964_v40 }
 0x4b8   : > { %1599 = vpow2.f32 %v1286_v41 }
 0x4c2   : > { %v1600_v42 = vpop.eup %1599 }
 0x4c3   : > { %v968_v43 = vadd.f32 1.0, %v1600_v42 }
 0x4c5   : > { %1601 = vrcp.f32 %v968_v43 }
 0x4cf   : > { %v1602_v0 = vpop.eup %1601 }
 0x4d0   : > { %v971_v44 = vmul.f32 %v1602_v0, %v956_v33 }
 0x4d2   : > { %v972_v45 = vadd.f32 %v971_v44, %v848_v21 }
 0x4d4   : > { %v973_v46 = vpack.c.bf16 %v972_v45, %v972_v45 }
 0x4d6   : > { %1443 = vmatmul.mubr.bf16.vlgmr.msra.gmra.mrb[8].mxu0 %v973_v46 }
 0x5a9   : > { %v1079_v48 = vpop.f32.mrb[8].mxu0 }
 0x5aa   : > { %v1080_v49 = vadd.f32 %v1287_v47, %v1079_v48  ;;  %v1444_v50 = vpop.f32.mrb[9].mxu0 }
 0x5ab   : > { %v1082_v51 = vpop.f32.mrb[10].mxu0 }
 0x5ac   : > { %v1085_v52 = vmul.f32 %v1080_v49, %v1080_v49  ;;  %v1445_v53 = vpop.f32.mrb[11].mxu0 }
 0x5ae   : > { %v1086_v54 = vmul.f32 0.071354814, %v1085_v52 }
 0x5b0   : > { %v1087_v55 = vadd.f32 1.5957692, %v1086_v54 }
 0x5b2   : > { %v1088_v56 = vmul.f32 %v1087_v55, %v1080_v49 }
 0x5b4   : > { %v1296_v57 = vmul.f32 -1.442695, %v1088_v56 }
 0x5b6   : > { %1603 = vpow2.f32 %v1296_v57 }
 0x5c0   : > { %v1604_v58 = vpop.eup %1603 }
 0x5c1   : > { %v1092_v59 = vadd.f32 1.0, %v1604_v58 }
 0x5c3   : > { %1605 = vrcp.f32 %v1092_v59 }
 0x5cd   : > { %v1606_v60 = vpop.eup %1605 }
 0x5ce   : > { %v1095_v61 = vmul.f32 %v1606_v60, %v1080_v49 }
 0x5d0   : > { %1096 = vst [vmem:[%s474_s13] sm:$0xff] %v1095_v61 }
 0x5d1   : > { %1790 = shalt.err (!%p1787_p3)
}
 0x5d2   : > { %s1791_s1 = scalar_lea.hbm %s2267_s12, 128  ;;  %s1795_s24 = scalar_lea.hbm %s2349_s27, 256 }
 0x5d3   : > { %p1792_p6 = scmp.ne.s32.totalorder %s2267_s12, %s1791_s1  ;;  %p1796_p8 = scmp.lt.u32.totalorder %s2267_s12, %s2349_s27 }
 0x5d4   : > { %p1797_p5 = scmp.lt.u32.totalorder %s1795_s24, %s1791_s1  ;;  %p1799_p7 = scmp.lt.u32.totalorder %s1791_s1, %s2267_s12 }
 0x5d5   : > { %p1793_p10 = pnand %p1792_p6, %p2350_p4 }
 0x5d6   : > { %p1798_p9 = por %p1797_p5, %p1796_p8 }
 0x5d7   : > { %p1794_p11 = pneg %p1793_p10 }
 0x5d8   : > { %p1800_p12 = por %p1799_p7, %p1798_p9 }
 0x5da   : > { %p1801_p1 = pnand %p1800_p12, %p1794_p11 }
 0x5dc   : > { %1804 = shalt.err (!%p1801_p1)
}
 0x5dd   : > { %1468 = dma.vmem_to_hbm [thread:$0]  (%p2350_p4), %s2269_s26, 128, %s2267_s12, %s1098_s22  }
 0x5de PF: > { %s1123_s29 = sand.u32 1, %s1843_s17   ;;  %p2351_p13 = scmp.ne.s32.totalorder %s2338_s14, 0 }
 0x5df   : > { %p2352_p0 = scmp.ge.s32.totalorder %s1855_s20, 2  ;;  %s1124_s8 = scalar_lea.sflag [#allocation4], %s1123_s29 }
 0x5e1   : > { %p1491_p2 = pnand %p2352_p0, %p2351_p13 }
 0x5e3   : > { %1838 = dma.done.wait (!%p1491_p2), %s1124_s8, 128  }
 0x5e4   : > { %1840 = vsyncadd (!%p1491_p2), %s1124_s8, 4294967168  ;;  %p27_p3 = scmp.ge.s32.totalorder %s2101_s16, 4   ;;  %s2353_s17 = smov %s1847_s18 }
 0x5e5   : > { %s2354_s18 = smov %s1851_s19  ;;  %s2355_s19 = smov %s2113_s10 }
 0x5e6   : > { %s2356_s20 = smov %s2101_s16  ;;  %29 = sbr.rel (!%p27_p3) target bundleno = 13 (0xd), region = 129 }
 0x5ed   :  { %1129 = vsyncpa [#allocation3], 1 }
 0x5ee   :  { %1131 = vsyncpa [#allocation3 + $0x1], 1 }
 0x5ef   :  { %1132 = vsyncpa [#allocation6], 1 }
 0x5f0   :  { %1133 = vsyncpa [#allocation9], 1 }
 0x5f1   :  { %1134 = vsyncpa [#allocation12], 1 }
 0x5f2   :  { %1135 = vsyncpa [#allocation4], 1 }
 0x5f3   :  { %1137 = vsyncpa [#allocation4 + $0x1], 1 }

</bundles_post_ra>
